<compile_context>
chip_gen: v6e
topology: v6e:2x2x1
jax: 0.10.0
libtpu: 0.0.40
codegen_flags: <defaults>
</compile_context>

<pallas_src>
import functools

import jax
import jax.numpy as jnp
from jax.experimental import pallas as pl
from jax.experimental.pallas import tpu as pltpu


def _mos_kernel(x_ref, wl_ref, bl_ref, wp_ref, wd_ref, bd_ref, out_ref,
                h_ref, prior_ref, m_ref, s_ref, mix_ref,
                *, n_experts, d_pad, tm):
    E, d = n_experts, d_pad
    p = pl.program_id(1)   # pass index: 0 = stats, 1 = emit
    v = pl.program_id(2)   # vocab tile index

    # ---- once per row tile: latent + prior matmuls, stat init --------------
    @pl.when(jnp.logical_and(p == 0, v == 0))
    def _init():
        x = x_ref[...]                                            # (tm, d) bf16
        lat = jnp.tanh(
            jnp.dot(x, wl_ref[...], preferred_element_type=jnp.float32)
            + bl_ref[...])                                        # (tm, E*d) f32
        # Stack per-expert latents along rows so the decoder is a single
        # (E*tm, d) @ (d, tv) matmul per vocab tile (W_dec pushed once).
        h_ref[...] = jnp.concatenate(
            [lat[:, e * d:(e + 1) * d] for e in range(E)], axis=0
        ).astype(h_ref.dtype)                                     # (E*tm, d) bf16

        # prior = softmax over experts (exact normalization; once per tile).
        pls = jnp.dot(x, wp_ref[...], preferred_element_type=jnp.float32)
        pls = pls - jnp.max(pls, axis=-1, keepdims=True)
        pe = jnp.exp(pls)
        prior_ref[...] = pe / jnp.sum(pe, axis=-1, keepdims=True)

        m_ref[...] = jnp.full(m_ref.shape, -jnp.inf, m_ref.dtype)
        s_ref[...] = jnp.zeros(s_ref.shape, s_ref.dtype)

    # ---- fused decoder logits for this vocab tile (all experts at once) ----
    logits = jnp.dot(h_ref[...], wd_ref[...],
                     preferred_element_type=jnp.float32) + bd_ref[...]
    # logits: (E*tm, tv) f32

    # ---- pass 0: running max / sum-of-exp, streamed per expert -------------
    @pl.when(p == 0)
    def _stats():
        m_old = m_ref[...]
        s_old = s_ref[...]
        new_m, new_s = [], []
        for e in range(E):
            le = logits[e * tm:(e + 1) * tm, :]
            mo = m_old[e * tm:(e + 1) * tm, :]
            mn = jnp.maximum(mo, jnp.max(le, axis=-1, keepdims=True))
            new_s.append(s_old[e * tm:(e + 1) * tm, :] * jnp.exp(mo - mn)
                         + jnp.sum(jnp.exp(le - mn), axis=-1, keepdims=True))
            new_m.append(mn)
        m_ref[...] = jnp.concatenate(new_m, axis=0)
        s_ref[...] = jnp.concatenate(new_s, axis=0)

    # ---- once per row tile (first emit step): hoisted mixing weights -------
    @pl.when(jnp.logical_and(p == 1, v == 0))
    def _fold():
        prior = prior_ref[...]                                    # (tm, E)
        inv_s = 1.0 / s_ref[...]                                  # exact, (E*tm, 1)
        mix_ref[...] = jnp.concatenate(
            [prior[:, e:e + 1] for e in range(E)], axis=0) * inv_s

    # ---- pass 1: normalize, weight by prior, mix over experts, write -------
    @pl.when(p == 1)
    def _emit():
        m_all = m_ref[...]
        mix = mix_ref[...]
        acc = jnp.zeros(out_ref.shape, jnp.float32)               # (tm, tv)
        for e in range(E):
            le = logits[e * tm:(e + 1) * tm, :]
            acc = acc + (jnp.exp(le - m_all[e * tm:(e + 1) * tm, :])
                         * mix[e * tm:(e + 1) * tm, :])
        out_ref[...] = acc.astype(out_ref.dtype)


def _vmem_budget_bytes():
    cap = 128 * 1024 * 1024
    try:
        cap = int(pltpu.get_tpu_info().vmem_capacity_bytes)
    except Exception:
        pass
    return min((cap * 3) // 4, 100 * 1024 * 1024)


def mos_head(x, w_prior, w_latent, b_latent, w_dec, b_dec, *,
             tm=None, tv=None, out_dtype=jnp.float32):
    """x: (N, d_model) -> (N, voc_size). Weights stored as (in, out)."""
    N, d = x.shape
    E = w_prior.shape[1]
    V = w_dec.shape[1]
    assert w_latent.shape == (d, E * d)
    assert w_prior.shape[0] == d and w_dec.shape[0] == d

    # Generation-aware VMEM budget and default tiles (review items).
    vmem_limit = _vmem_budget_bytes()
    small_vmem = vmem_limit <= 48 * 1024 * 1024        # v7x-class (64 MiB phys)
    if tm is None:
        tm = 256
    if tv is None:
        tv = 512 if small_vmem else 1024
    assert tm % 8 == 0

    tv = min(tv, V)
    if V % tv != 0 or (tv % 128 != 0 and tv != V):
        tv = next((t for t in range(tv - tv % 128, 0, -128) if V % t == 0), V)
    assert V % tv == 0

    # Pad d_model up to a multiple of 128 so per-expert slices / MXU
    # contractions are lane-aligned (review item).  Zero padding is exact:
    # padded latent columns are tanh(0)=0 and padded W_dec rows are 0.
    dp = int(pl.cdiv(d, 128) * 128)
    b_latent = jnp.reshape(b_latent, (E, d))
    b_dec = jnp.reshape(b_dec, (1, V))
    if dp != d:
        fpad = dp - d
        x = jnp.pad(x, ((0, 0), (0, fpad)))
        w_prior = jnp.pad(w_prior, ((0, fpad), (0, 0)))
        w_dec = jnp.pad(w_dec, ((0, fpad), (0, 0)))
        w_latent = jnp.pad(w_latent.reshape(d, E, d),
                           ((0, fpad), (0, 0), (0, fpad))).reshape(dp, E * dp)
        b_latent = jnp.pad(b_latent, ((0, 0), (0, fpad)))
    b_latent = b_latent.reshape(1, E * dp)

    # Pad rows up to a multiple of tm (padded rows are computed and discarded).
    n_pad = int(pl.cdiv(N, tm) * tm)
    if n_pad != N:
        x = jnp.pad(x, ((0, n_pad - N), (0, 0)))

    # bf16 operands for the MXU (f32 accumulation inside the kernel).
    x_bf = x.astype(jnp.bfloat16)
    w_lat_bf = w_latent.astype(jnp.bfloat16)
    w_pri_bf = w_prior.astype(jnp.bfloat16)
    w_dec_bf = w_dec.astype(jnp.bfloat16)
    b_lat = b_latent.astype(jnp.float32)
    b_d = b_dec.astype(jnp.float32)

    kernel = functools.partial(_mos_kernel, n_experts=E, d_pad=dp, tm=tm)
    grid = (n_pad // tm, 2, V // tv)

    out = pl.pallas_call(
        kernel,
        out_shape=jax.ShapeDtypeStruct((n_pad, V), out_dtype),
        grid_spec=pltpu.PrefetchScalarGridSpec(
            num_scalar_prefetch=0,
            grid=grid,
            in_specs=[
                pl.BlockSpec((tm, dp), lambda i, p, v: (i, 0)),        # x tile
                pl.BlockSpec((dp, E * dp), lambda i, p, v: (0, 0)),    # W_latent
                pl.BlockSpec((1, E * dp), lambda i, p, v: (0, 0)),     # b_latent
                pl.BlockSpec((dp, E), lambda i, p, v: (0, 0)),         # W_prior
                pl.BlockSpec((dp, tv), lambda i, p, v: (0, v)),        # W_dec V-tile
                pl.BlockSpec((1, tv), lambda i, p, v: (0, v)),         # b_dec V-tile
            ],
            # (i, v*p): frozen at (i, 0) during the stats pass -> no spurious
            # writebacks of unwritten output tiles in pass 0.
            out_specs=pl.BlockSpec((tm, tv), lambda i, p, v: (i, v * p)),
            scratch_shapes=[
                pltpu.VMEM((E * tm, dp), jnp.bfloat16),   # stacked expert latents
                pltpu.VMEM((tm, E), jnp.float32),         # prior probabilities
                pltpu.VMEM((E * tm, 1), jnp.float32),     # running max
                pltpu.VMEM((E * tm, 1), jnp.float32),     # running sum of exp
                pltpu.VMEM((E * tm, 1), jnp.float32),     # prior / s mixing weights
            ]),
        compiler_params=pltpu.CompilerParams(
            dimension_semantics=("parallel", "arbitrary", "arbitrary"),
            vmem_limit_bytes=int(vmem_limit)),
    )(x_bf, w_lat_bf, b_lat, w_pri_bf, w_dec_bf, b_d)
    return out[:N]


def mos_head_ref(x, w_prior, w_latent, b_latent, w_dec, b_dec):
    """Plain-JAX f32 reference mirroring the PyTorch forward."""
    N, d_model = x.shape
    n_experts = w_prior.shape[1]
    voc_size = w_dec.shape[1]
    latent = jnp.tanh(x @ w_latent + jnp.reshape(b_latent, (1, -1)))   # (N, E*d)
    logit = latent.reshape(-1, d_model) @ w_dec + jnp.reshape(b_dec, (1, -1))
    prior = jax.nn.softmax(x @ w_prior, axis=1)                        # (N, E)
    prob = jax.nn.softmax(logit, axis=1).reshape(-1, n_experts, voc_size)
    return jnp.sum(prob * prior[:, :, None], axis=1)                   # (N, V)


if __name__ == "__main__":
    # Small MoShead-consistent shapes: batch=2, seq=8 -> N=16 rows,
    # d_model=32, n_experts=4, voc_size=512.  tm=8 / tv=256 exercises
    # multiple row tiles, both passes and multiple vocab tiles.
    batch, seq = 2, 8
    d_model, n_experts, voc_size = 32, 4, 512
    N = batch * seq

    key = jax.random.PRNGKey(0)
    kx, kp, kl, kbl, kd, kbd = jax.random.split(key, 6)

    x = jax.random.normal(kx, (batch, seq, d_model), jnp.float32)
    x2 = x.reshape(N, d_model)   # flatten leading dims (PyTorch .view(-1, d_model))

    scale = 0.05
    w_prior = scale * jax.random.normal(kp, (d_model, n_experts), jnp.float32)
    w_latent = scale * jax.random.normal(kl, (d_model, n_experts * d_model), jnp.float32)
    b_latent = scale * jax.random.normal(kbl, (1, n_experts * d_model), jnp.float32)
    w_dec = scale * jax.random.normal(kd, (d_model, voc_size), jnp.float32)
    b_dec = scale * jax.random.normal(kbd, (1, voc_size), jnp.float32)

    out = mos_head(x2, w_prior, w_latent, b_latent, w_dec, b_dec, tm=8, tv=256)
    out = jax.block_until_ready(out)

    ref = mos_head_ref(x2, w_prior, w_latent, b_latent, w_dec, b_dec)
    assert out.shape == (N, voc_size)
    max_err = float(jnp.max(jnp.abs(out - ref)))
    # bf16 matmuls vs f32 reference -> relaxed elementwise tolerance.
    assert jnp.allclose(out, ref, atol=1e-3, rtol=5e-2), f"max abs err {max_err}"
    # Mixture of softmaxes with exact normalization: rows sum to ~1.
    row_sums = jnp.sum(out, axis=-1)
    assert jnp.allclose(row_sums, 1.0, atol=2e-3), \
        f"row-sum max dev {float(jnp.max(jnp.abs(row_sums - 1.0)))}"

    print("KERNEL_OK")
</pallas_src>

<mosaic_0001>
module attributes {stable_mosaic.version = 11 : i64} {
  func.func @_mos_kernel(%arg0: i32, %arg1: i32, %arg2: i32, %arg3: memref<8x128xbf16, #tpu.memory_space<vmem>>, %arg4: memref<128x512xbf16, #tpu.memory_space<vmem>>, %arg5: memref<1x512xf32, #tpu.memory_space<vmem>>, %arg6: memref<128x4xbf16, #tpu.memory_space<vmem>>, %arg7: memref<128x256xbf16, #tpu.memory_space<vmem>>, %arg8: memref<1x256xf32, #tpu.memory_space<vmem>>, %arg9: memref<8x256xf32, #tpu.memory_space<vmem>>, %arg10: memref<32x128xbf16, #tpu.memory_space<vmem>>, %arg11: memref<8x4xf32, #tpu.memory_space<vmem>>, %arg12: memref<32x1xf32, #tpu.memory_space<vmem>>, %arg13: memref<32x1xf32, #tpu.memory_space<vmem>>, %arg14: memref<32x1xf32, #tpu.memory_space<vmem>>) attributes {dimension_semantics = [#tpu.dimension_semantics<parallel>, #tpu.dimension_semantics<arbitrary>, #tpu.dimension_semantics<arbitrary>], iteration_bounds = array<i64: 2, 2, 2>, scalar_prefetch = 0 : i64, scratch_operands = 5 : i64, tpu.core_type = #tpu.core_type<tc>, window_params = [{transform_indices = @transform_0, window_bounds = array<i64: 8, 128>}, {pipeline_mode = #tpu.pipeline_mode<synchronous>, transform_indices = @transform_1, window_bounds = array<i64: 128, 512>}, {pipeline_mode = #tpu.pipeline_mode<synchronous>, transform_indices = @transform_2, window_bounds = array<i64: 1, 512>}, {pipeline_mode = #tpu.pipeline_mode<synchronous>, transform_indices = @transform_3, window_bounds = array<i64: 128, 4>}, {transform_indices = @transform_4, window_bounds = array<i64: 128, 256>}, {transform_indices = @transform_5, window_bounds = array<i64: 1, 256>}, {transform_indices = @transform_6, window_bounds = array<i64: 8, 256>}]} {
    %c0_i32 = arith.constant 0 : i32
    %0 = arith.cmpi eq, %arg1, %c0_i32 : i32
    %c0_i32_0 = arith.constant 0 : i32
    %1 = arith.cmpi eq, %arg2, %c0_i32_0 : i32
    %2 = arith.andi %0, %1 : i1
    %3 = arith.extui %2 : i1 to i32
    %c0_i32_1 = arith.constant 0 : i32
    %4 = arith.cmpi ne, %3, %c0_i32_1 : i32
    scf.if %4 {
      %c0_13 = arith.constant 0 : index
      %c0_14 = arith.constant 0 : index
      %22 = vector.load %arg3[%c0_13, %c0_14] : memref<8x128xbf16, #tpu.memory_space<vmem>>, vector<8x128xbf16>
      %c0_15 = arith.constant 0 : index
      %c0_16 = arith.constant 0 : index
      %23 = vector.load %arg4[%c0_15, %c0_16] : memref<128x512xbf16, #tpu.memory_space<vmem>>, vector<128x512xbf16>
      %cst_17 = arith.constant dense<0.000000e+00> : vector<8x512xf32>
      %24 = tpu.matmul %22, %23, %cst_17 {dimension_numbers = #tpu.dot_dimension_numbers<[1], [0], [0], [1], [0, 0, 1, 1], [], []>} : vector<8x128xbf16>, vector<128x512xbf16>, vector<8x512xf32> -> vector<8x512xf32>
      %c0_18 = arith.constant 0 : index
      %c0_19 = arith.constant 0 : index
      %25 = vector.load %arg5[%c0_18, %c0_19] : memref<1x512xf32, #tpu.memory_space<vmem>>, vector<1x512xf32>
      %26 = vector.broadcast %25 : vector<1x512xf32> to vector<8x512xf32>
      %27 = arith.addf %24, %26 : vector<8x512xf32>
      %28 = math.tanh %27 : vector<8x512xf32>
      %29 = vector.extract_strided_slice %28 {offsets = [0, 0], sizes = [8, 128], strides = [1, 1]} : vector<8x512xf32> to vector<8x128xf32>
      %30 = vector.extract_strided_slice %28 {offsets = [0, 128], sizes = [8, 128], strides = [1, 1]} : vector<8x512xf32> to vector<8x128xf32>
      %31 = vector.extract_strided_slice %28 {offsets = [0, 256], sizes = [8, 128], strides = [1, 1]} : vector<8x512xf32> to vector<8x128xf32>
      %32 = vector.extract_strided_slice %28 {offsets = [0, 384], sizes = [8, 128], strides = [1, 1]} : vector<8x512xf32> to vector<8x128xf32>
      %33 = tpu.concatenate %29, %30, %31, %32 in 0 : vector<8x128xf32>, vector<8x128xf32>, vector<8x128xf32>, vector<8x128xf32> -> vector<32x128xf32>
      %34 = arith.truncf %33 : vector<32x128xf32> to vector<32x128xbf16>
      %c0_20 = arith.constant 0 : index
      %c0_21 = arith.constant 0 : index
      %35 = vector.load %arg10[%c0_20, %c0_21] : memref<32x128xbf16, #tpu.memory_space<vmem>>, vector<32x128xbf16>
      tpu.vector_store %arg10[%c0_20, %c0_21], %34 {strides = array<i32>} : memref<32x128xbf16, #tpu.memory_space<vmem>>, vector<32x128xbf16>,
      %c0_22 = arith.constant 0 : index
      %c0_23 = arith.constant 0 : index
      %36 = vector.load %arg6[%c0_22, %c0_23] : memref<128x4xbf16, #tpu.memory_space<vmem>>, vector<128x4xbf16>
      %cst_24 = arith.constant dense<0.000000e+00> : vector<8x4xf32>
      %37 = tpu.matmul %22, %36, %cst_24 {dimension_numbers = #tpu.dot_dimension_numbers<[1], [0], [0], [1], [0, 0, 1, 1], [], []>} : vector<8x128xbf16>, vector<128x4xbf16>, vector<8x4xf32> -> vector<8x4xf32>
      %cst_25 = arith.constant dense<0xFF800000> : vector<8xf32>
      %38 = vector.multi_reduction <maximumf>, %37, %cst_25 [1] : vector<8x4xf32> to vector<8xf32>
      %39 = vector.shape_cast %38 : vector<8xf32> to vector<8x1xf32>
      %40 = vector.broadcast %39 : vector<8x1xf32> to vector<8x4xf32>
      %41 = arith.subf %37, %40 : vector<8x4xf32>
      %42 = math.exp %41 : vector<8x4xf32>
      %cst_26 = arith.constant dense<0.000000e+00> : vector<8xf32>
      %43 = vector.multi_reduction <add>, %42, %cst_26 [1] : vector<8x4xf32> to vector<8xf32>
      %44 = vector.shape_cast %43 : vector<8xf32> to vector<8x1xf32>
      %45 = vector.broadcast %44 : vector<8x1xf32> to vector<8x4xf32>
      %46 = arith.divf %42, %45 : vector<8x4xf32>
      %c0_27 = arith.constant 0 : index
      %c0_28 = arith.constant 0 : index
      %47 = vector.load %arg11[%c0_27, %c0_28] : memref<8x4xf32, #tpu.memory_space<vmem>>, vector<8x4xf32>
      tpu.vector_store %arg11[%c0_27, %c0_28], %46 {strides = array<i32>} : memref<8x4xf32, #tpu.memory_space<vmem>>, vector<8x4xf32>,
      %cst_29 = arith.constant 0xFF800000 : f32
      %48 = vector.broadcast %cst_29 : f32 to vector<32x1xf32>
      %c0_30 = arith.constant 0 : index
      %c0_31 = arith.constant 0 : index
      %49 = vector.load %arg12[%c0_30, %c0_31] : memref<32x1xf32, #tpu.memory_space<vmem>>, vector<32x1xf32>
      tpu.vector_store %arg12[%c0_30, %c0_31], %48 {strides = array<i32>} : memref<32x1xf32, #tpu.memory_space<vmem>>, vector<32x1xf32>,
      %cst_32 = arith.constant 0.000000e+00 : f32
      %50 = vector.broadcast %cst_32 : f32 to vector<32x1xf32>
      %c0_33 = arith.constant 0 : index
      %c0_34 = arith.constant 0 : index
      %51 = vector.load %arg13[%c0_33, %c0_34] : memref<32x1xf32, #tpu.memory_space<vmem>>, vector<32x1xf32>
      tpu.vector_store %arg13[%c0_33, %c0_34], %50 {strides = array<i32>} : memref<32x1xf32, #tpu.memory_space<vmem>>, vector<32x1xf32>,
    } else {
    }
    %c0 = arith.constant 0 : index
    %c0_2 = arith.constant 0 : index
    %5 = vector.load %arg10[%c0, %c0_2] : memref<32x128xbf16, #tpu.memory_space<vmem>>, vector<32x128xbf16>
    %c0_3 = arith.constant 0 : index
    %c0_4 = arith.constant 0 : index
    %6 = vector.load %arg7[%c0_3, %c0_4] : memref<128x256xbf16, #tpu.memory_space<vmem>>, vector<128x256xbf16>
    %cst = arith.constant dense<0.000000e+00> : vector<32x256xf32>
    %7 = tpu.matmul %5, %6, %cst {dimension_numbers = #tpu.dot_dimension_numbers<[1], [0], [0], [1], [0, 0, 1, 1], [], []>} : vector<32x128xbf16>, vector<128x256xbf16>, vector<32x256xf32> -> vector<32x256xf32>
    %c0_5 = arith.constant 0 : index
    %c0_6 = arith.constant 0 : index
    %8 = vector.load %arg8[%c0_5, %c0_6] : memref<1x256xf32, #tpu.memory_space<vmem>>, vector<1x256xf32>
    %9 = vector.broadcast %8 : vector<1x256xf32> to vector<32x256xf32>
    %10 = arith.addf %7, %9 : vector<32x256xf32>
    %c0_i32_7 = arith.constant 0 : i32
    %11 = arith.cmpi eq, %arg1, %c0_i32_7 : i32
    %12 = arith.extui %11 : i1 to i32
    %c0_i32_8 = arith.constant 0 : i32
    %13 = arith.cmpi ne, %12, %c0_i32_8 : i32
    scf.if %13 {
      %c0_13 = arith.constant 0 : index
      %c0_14 = arith.constant 0 : index
      %22 = vector.load %arg12[%c0_13, %c0_14] : memref<32x1xf32, #tpu.memory_space<vmem>>, vector<32x1xf32>
      %c0_15 = arith.constant 0 : index
      %c0_16 = arith.constant 0 : index
      %23 = vector.load %arg13[%c0_15, %c0_16] : memref<32x1xf32, #tpu.memory_space<vmem>>, vector<32x1xf32>
      %24 = vector.extract_strided_slice %10 {offsets = [0, 0], sizes = [8, 256], strides = [1, 1]} : vector<32x256xf32> to vector<8x256xf32>
      %25 = vector.extract_strided_slice %22 {offsets = [0, 0], sizes = [8, 1], strides = [1, 1]} : vector<32x1xf32> to vector<8x1xf32>
      %cst_17 = arith.constant dense<0xFF800000> : vector<8xf32>
      %26 = vector.multi_reduction <maximumf>, %24, %cst_17 [1] : vector<8x256xf32> to vector<8xf32>
      %27 = vector.shape_cast %26 : vector<8xf32> to vector<8x1xf32>
      %28 = arith.maximumf %25, %27 : vector<8x1xf32>
      %29 = vector.extract_strided_slice %23 {offsets = [0, 0], sizes = [8, 1], strides = [1, 1]} : vector<32x1xf32> to vector<8x1xf32>
      %30 = arith.subf %25, %28 : vector<8x1xf32>
      %31 = math.exp %30 : vector<8x1xf32>
      %32 = arith.mulf %29, %31 : vector<8x1xf32>
      %33 = vector.broadcast %28 : vector<8x1xf32> to vector<8x256xf32>
      %34 = arith.subf %24, %33 : vector<8x256xf32>
      %35 = math.exp %34 : vector<8x256xf32>
      %cst_18 = arith.constant dense<0.000000e+00> : vector<8xf32>
      %36 = vector.multi_reduction <add>, %35, %cst_18 [1] : vector<8x256xf32> to vector<8xf32>
      %37 = vector.shape_cast %36 : vector<8xf32> to vector<8x1xf32>
      %38 = arith.addf %32, %37 : vector<8x1xf32>
      %39 = vector.extract_strided_slice %10 {offsets = [8, 0], sizes = [8, 256], strides = [1, 1]} : vector<32x256xf32> to vector<8x256xf32>
      %40 = vector.extract_strided_slice %22 {offsets = [8, 0], sizes = [8, 1], strides = [1, 1]} : vector<32x1xf32> to vector<8x1xf32>
      %cst_19 = arith.constant dense<0xFF800000> : vector<8xf32>
      %41 = vector.multi_reduction <maximumf>, %39, %cst_19 [1] : vector<8x256xf32> to vector<8xf32>
      %42 = vector.shape_cast %41 : vector<8xf32> to vector<8x1xf32>
      %43 = arith.maximumf %40, %42 : vector<8x1xf32>
      %44 = vector.extract_strided_slice %23 {offsets = [8, 0], sizes = [8, 1], strides = [1, 1]} : vector<32x1xf32> to vector<8x1xf32>
      %45 = arith.subf %40, %43 : vector<8x1xf32>
      %46 = math.exp %45 : vector<8x1xf32>
      %47 = arith.mulf %44, %46 : vector<8x1xf32>
      %48 = vector.broadcast %43 : vector<8x1xf32> to vector<8x256xf32>
      %49 = arith.subf %39, %48 : vector<8x256xf32>
      %50 = math.exp %49 : vector<8x256xf32>
      %cst_20 = arith.constant dense<0.000000e+00> : vector<8xf32>
      %51 = vector.multi_reduction <add>, %50, %cst_20 [1] : vector<8x256xf32> to vector<8xf32>
      %52 = vector.shape_cast %51 : vector<8xf32> to vector<8x1xf32>
      %53 = arith.addf %47, %52 : vector<8x1xf32>
      %54 = vector.extract_strided_slice %10 {offsets = [16, 0], sizes = [8, 256], strides = [1, 1]} : vector<32x256xf32> to vector<8x256xf32>
      %55 = vector.extract_strided_slice %22 {offsets = [16, 0], sizes = [8, 1], strides = [1, 1]} : vector<32x1xf32> to vector<8x1xf32>
      %cst_21 = arith.constant dense<0xFF800000> : vector<8xf32>
      %56 = vector.multi_reduction <maximumf>, %54, %cst_21 [1] : vector<8x256xf32> to vector<8xf32>
      %57 = vector.shape_cast %56 : vector<8xf32> to vector<8x1xf32>
      %58 = arith.maximumf %55, %57 : vector<8x1xf32>
      %59 = vector.extract_strided_slice %23 {offsets = [16, 0], sizes = [8, 1], strides = [1, 1]} : vector<32x1xf32> to vector<8x1xf32>
      %60 = arith.subf %55, %58 : vector<8x1xf32>
      %61 = math.exp %60 : vector<8x1xf32>
      %62 = arith.mulf %59, %61 : vector<8x1xf32>
      %63 = vector.broadcast %58 : vector<8x1xf32> to vector<8x256xf32>
      %64 = arith.subf %54, %63 : vector<8x256xf32>
      %65 = math.exp %64 : vector<8x256xf32>
      %cst_22 = arith.constant dense<0.000000e+00> : vector<8xf32>
      %66 = vector.multi_reduction <add>, %65, %cst_22 [1] : vector<8x256xf32> to vector<8xf32>
      %67 = vector.shape_cast %66 : vector<8xf32> to vector<8x1xf32>
      %68 = arith.addf %62, %67 : vector<8x1xf32>
      %69 = vector.extract_strided_slice %10 {offsets = [24, 0], sizes = [8, 256], strides = [1, 1]} : vector<32x256xf32> to vector<8x256xf32>
      %70 = vector.extract_strided_slice %22 {offsets = [24, 0], sizes = [8, 1], strides = [1, 1]} : vector<32x1xf32> to vector<8x1xf32>
      %cst_23 = arith.constant dense<0xFF800000> : vector<8xf32>
      %71 = vector.multi_reduction <maximumf>, %69, %cst_23 [1] : vector<8x256xf32> to vector<8xf32>
      %72 = vector.shape_cast %71 : vector<8xf32> to vector<8x1xf32>
      %73 = arith.maximumf %70, %72 : vector<8x1xf32>
      %74 = vector.extract_strided_slice %23 {offsets = [24, 0], sizes = [8, 1], strides = [1, 1]} : vector<32x1xf32> to vector<8x1xf32>
      %75 = arith.subf %70, %73 : vector<8x1xf32>
      %76 = math.exp %75 : vector<8x1xf32>
      %77 = arith.mulf %74, %76 : vector<8x1xf32>
      %78 = vector.broadcast %73 : vector<8x1xf32> to vector<8x256xf32>
      %79 = arith.subf %69, %78 : vector<8x256xf32>
      %80 = math.exp %79 : vector<8x256xf32>
      %cst_24 = arith.constant dense<0.000000e+00> : vector<8xf32>
      %81 = vector.multi_reduction <add>, %80, %cst_24 [1] : vector<8x256xf32> to vector<8xf32>
      %82 = vector.shape_cast %81 : vector<8xf32> to vector<8x1xf32>
      %83 = arith.addf %77, %82 : vector<8x1xf32>
      %84 = tpu.concatenate %28, %43, %58, %73 in 0 : vector<8x1xf32>, vector<8x1xf32>, vector<8x1xf32>, vector<8x1xf32> -> vector<32x1xf32>
      %c0_25 = arith.constant 0 : index
      %c0_26 = arith.constant 0 : index
      %85 = vector.load %arg12[%c0_25, %c0_26] : memref<32x1xf32, #tpu.memory_space<vmem>>, vector<32x1xf32>
      tpu.vector_store %arg12[%c0_25, %c0_26], %84 {strides = array<i32>} : memref<32x1xf32, #tpu.memory_space<vmem>>, vector<32x1xf32>,
      %86 = tpu.concatenate %38, %53, %68, %83 in 0 : vector<8x1xf32>, vector<8x1xf32>, vector<8x1xf32>, vector<8x1xf32> -> vector<32x1xf32>
      %c0_27 = arith.constant 0 : index
      %c0_28 = arith.constant 0 : index
      %87 = vector.load %arg13[%c0_27, %c0_28] : memref<32x1xf32, #tpu.memory_space<vmem>>, vector<32x1xf32>
      tpu.vector_store %arg13[%c0_27, %c0_28], %86 {strides = array<i32>} : memref<32x1xf32, #tpu.memory_space<vmem>>, vector<32x1xf32>,
    } else {
    }
    %c1_i32 = arith.constant 1 : i32
    %14 = arith.cmpi eq, %arg1, %c1_i32 : i32
    %c0_i32_9 = arith.constant 0 : i32
    %15 = arith.cmpi eq, %arg2, %c0_i32_9 : i32
    %16 = arith.andi %14, %15 : i1
    %17 = arith.extui %16 : i1 to i32
    %c0_i32_10 = arith.constant 0 : i32
    %18 = arith.cmpi ne, %17, %c0_i32_10 : i32
    scf.if %18 {
      %c0_13 = arith.constant 0 : index
      %c0_14 = arith.constant 0 : index
      %22 = vector.load %arg11[%c0_13, %c0_14] : memref<8x4xf32, #tpu.memory_space<vmem>>, vector<8x4xf32>
      %c0_15 = arith.constant 0 : index
      %c0_16 = arith.constant 0 : index
      %23 = vector.load %arg13[%c0_15, %c0_16] : memref<32x1xf32, #tpu.memory_space<vmem>>, vector<32x1xf32>
      %cst_17 = arith.constant 1.000000e+00 : f32
      %24 = vector.broadcast %cst_17 : f32 to vector<32x1xf32>
      %25 = arith.divf %24, %23 : vector<32x1xf32>
      %26 = vector.extract_strided_slice %22 {offsets = [0, 0], sizes = [8, 1], strides = [1, 1]} : vector<8x4xf32> to vector<8x1xf32>
      %27 = vector.extract_strided_slice %22 {offsets = [0, 1], sizes = [8, 1], strides = [1, 1]} : vector<8x4xf32> to vector<8x1xf32>
      %28 = vector.extract_strided_slice %22 {offsets = [0, 2], sizes = [8, 1], strides = [1, 1]} : vector<8x4xf32> to vector<8x1xf32>
      %29 = vector.extract_strided_slice %22 {offsets = [0, 3], sizes = [8, 1], strides = [1, 1]} : vector<8x4xf32> to vector<8x1xf32>
      %30 = tpu.concatenate %26, %27, %28, %29 in 0 : vector<8x1xf32>, vector<8x1xf32>, vector<8x1xf32>, vector<8x1xf32> -> vector<32x1xf32>
      %31 = arith.mulf %30, %25 : vector<32x1xf32>
      %c0_18 = arith.constant 0 : index
      %c0_19 = arith.constant 0 : index
      %32 = vector.load %arg14[%c0_18, %c0_19] : memref<32x1xf32, #tpu.memory_space<vmem>>, vector<32x1xf32>
      tpu.vector_store %arg14[%c0_18, %c0_19], %31 {strides = array<i32>} : memref<32x1xf32, #tpu.memory_space<vmem>>, vector<32x1xf32>,
    } else {
    }
    %c1_i32_11 = arith.constant 1 : i32
    %19 = arith.cmpi eq, %arg1, %c1_i32_11 : i32
    %20 = arith.extui %19 : i1 to i32
    %c0_i32_12 = arith.constant 0 : i32
    %21 = arith.cmpi ne, %20, %c0_i32_12 : i32
    scf.if %21 {
      %c0_13 = arith.constant 0 : index
      %c0_14 = arith.constant 0 : index
      %22 = vector.load %arg12[%c0_13, %c0_14] : memref<32x1xf32, #tpu.memory_space<vmem>>, vector<32x1xf32>
      %c0_15 = arith.constant 0 : index
      %c0_16 = arith.constant 0 : index
      %23 = vector.load %arg14[%c0_15, %c0_16] : memref<32x1xf32, #tpu.memory_space<vmem>>, vector<32x1xf32>
      %cst_17 = arith.constant 0.000000e+00 : f32
      %24 = vector.broadcast %cst_17 : f32 to vector<8x256xf32>
      %25 = vector.extract_strided_slice %10 {offsets = [0, 0], sizes = [8, 256], strides = [1, 1]} : vector<32x256xf32> to vector<8x256xf32>
      %26 = vector.extract_strided_slice %22 {offsets = [0, 0], sizes = [8, 1], strides = [1, 1]} : vector<32x1xf32> to vector<8x1xf32>
      %27 = vector.broadcast %26 : vector<8x1xf32> to vector<8x256xf32>
      %28 = arith.subf %25, %27 : vector<8x256xf32>
      %29 = math.exp %28 : vector<8x256xf32>
      %30 = vector.extract_strided_slice %23 {offsets = [0, 0], sizes = [8, 1], strides = [1, 1]} : vector<32x1xf32> to vector<8x1xf32>
      %31 = vector.broadcast %30 : vector<8x1xf32> to vector<8x256xf32>
      %32 = arith.mulf %29, %31 : vector<8x256xf32>
      %33 = arith.addf %24, %32 : vector<8x256xf32>
      %34 = vector.extract_strided_slice %10 {offsets = [8, 0], sizes = [8, 256], strides = [1, 1]} : vector<32x256xf32> to vector<8x256xf32>
      %35 = vector.extract_strided_slice %22 {offsets = [8, 0], sizes = [8, 1], strides = [1, 1]} : vector<32x1xf32> to vector<8x1xf32>
      %36 = vector.broadcast %35 : vector<8x1xf32> to vector<8x256xf32>
      %37 = arith.subf %34, %36 : vector<8x256xf32>
      %38 = math.exp %37 : vector<8x256xf32>
      %39 = vector.extract_strided_slice %23 {offsets = [8, 0], sizes = [8, 1], strides = [1, 1]} : vector<32x1xf32> to vector<8x1xf32>
      %40 = vector.broadcast %39 : vector<8x1xf32> to vector<8x256xf32>
      %41 = arith.mulf %38, %40 : vector<8x256xf32>
      %42 = arith.addf %33, %41 : vector<8x256xf32>
      %43 = vector.extract_strided_slice %10 {offsets = [16, 0], sizes = [8, 256], strides = [1, 1]} : vector<32x256xf32> to vector<8x256xf32>
      %44 = vector.extract_strided_slice %22 {offsets = [16, 0], sizes = [8, 1], strides = [1, 1]} : vector<32x1xf32> to vector<8x1xf32>
      %45 = vector.broadcast %44 : vector<8x1xf32> to vector<8x256xf32>
      %46 = arith.subf %43, %45 : vector<8x256xf32>
      %47 = math.exp %46 : vector<8x256xf32>
      %48 = vector.extract_strided_slice %23 {offsets = [16, 0], sizes = [8, 1], strides = [1, 1]} : vector<32x1xf32> to vector<8x1xf32>
      %49 = vector.broadcast %48 : vector<8x1xf32> to vector<8x256xf32>
      %50 = arith.mulf %47, %49 : vector<8x256xf32>
      %51 = arith.addf %42, %50 : vector<8x256xf32>
      %52 = vector.extract_strided_slice %10 {offsets = [24, 0], sizes = [8, 256], strides = [1, 1]} : vector<32x256xf32> to vector<8x256xf32>
      %53 = vector.extract_strided_slice %22 {offsets = [24, 0], sizes = [8, 1], strides = [1, 1]} : vector<32x1xf32> to vector<8x1xf32>
      %54 = vector.broadcast %53 : vector<8x1xf32> to vector<8x256xf32>
      %55 = arith.subf %52, %54 : vector<8x256xf32>
      %56 = math.exp %55 : vector<8x256xf32>
      %57 = vector.extract_strided_slice %23 {offsets = [24, 0], sizes = [8, 1], strides = [1, 1]} : vector<32x1xf32> to vector<8x1xf32>
      %58 = vector.broadcast %57 : vector<8x1xf32> to vector<8x256xf32>
      %59 = arith.mulf %56, %58 : vector<8x256xf32>
      %60 = arith.addf %51, %59 : vector<8x256xf32>
      %c0_18 = arith.constant 0 : index
      %c0_19 = arith.constant 0 : index
      %61 = vector.load %arg9[%c0_18, %c0_19] : memref<8x256xf32, #tpu.memory_space<vmem>>, vector<8x256xf32>
      tpu.vector_store %arg9[%c0_18, %c0_19], %60 {strides = array<i32>} : memref<8x256xf32, #tpu.memory_space<vmem>>, vector<8x256xf32>,
    } else {
    }
    return
  }
  func.func @transform_0(%arg0: i32, %arg1: i32, %arg2: i32) -> (i32, i32) {
    %c0_i32 = arith.constant 0 : i32
    %c0_i32_0 = arith.constant 0 : i32
    return %arg0, %c0_i32 : i32, i32
  }
  func.func @transform_1(%arg0: i32, %arg1: i32, %arg2: i32) -> (i32, i32) {
    %c0_i32 = arith.constant 0 : i32
    %c0_i32_0 = arith.constant 0 : i32
    %c0_i32_1 = arith.constant 0 : i32
    return %c0_i32, %c0_i32_0 : i32, i32
  }
  func.func @transform_2(%arg0: i32, %arg1: i32, %arg2: i32) -> (i32, i32) {
    %c0_i32 = arith.constant 0 : i32
    %c0_i32_0 = arith.constant 0 : i32
    %c0_i32_1 = arith.constant 0 : i32
    return %c0_i32, %c0_i32_0 : i32, i32
  }
  func.func @transform_3(%arg0: i32, %arg1: i32, %arg2: i32) -> (i32, i32) {
    %c0_i32 = arith.constant 0 : i32
    %c0_i32_0 = arith.constant 0 : i32
    %c0_i32_1 = arith.constant 0 : i32
    return %c0_i32, %c0_i32_0 : i32, i32
  }
  func.func @transform_4(%arg0: i32, %arg1: i32, %arg2: i32) -> (i32, i32) {
    %c0_i32 = arith.constant 0 : i32
    %c0_i32_0 = arith.constant 0 : i32
    return %c0_i32, %arg2 : i32, i32
  }
  func.func @transform_5(%arg0: i32, %arg1: i32, %arg2: i32) -> (i32, i32) {
    %c0_i32 = arith.constant 0 : i32
    %c0_i32_0 = arith.constant 0 : i32
    return %c0_i32, %arg2 : i32, i32
  }
  func.func @transform_6(%arg0: i32, %arg1: i32, %arg2: i32) -> (i32, i32) {
    %0 = arith.muli %arg2, %arg1 : i32
    %c0_i32 = arith.constant 0 : i32
    return %arg0, %0 : i32, i32
  }
}

</mosaic_0001>

<bundles_post_ra>
// kernel: tpu_custom_call.1
= control target key start
LH: loop header
LB: loop body
LE: loop exit
PB: predicated region body
PF: predicated region fallthrough
CT: control target
= control target key end

     0   :  { %s2456_s0 = inlined_call_operand.vmem [shape: bf16[16,128], index: 0, kind: input, shape index: {}]   ;;  %s2457_s1 = inlined_call_operand.hbm [shape: bf16[128,512], index: 1, kind: input, shape index: {}]   ;;  %s2458_s2 = inlined_call_operand.vmem [shape: f32[1,512], index: 2, kind: input, shape index: {}]   ;;  %s2459_s3 = inlined_call_operand.vmem [shape: bf16[128,4], index: 3, kind: input, shape index: {}]   ;;  %s2460_s4 = inlined_call_operand.hbm [shape: bf16[128,512], index: 4, kind: input, shape index: {}]   ;;  %s2461_s5 = inlined_call_operand.vmem [shape: f32[1,512], index: 5, kind: input, shape index: {}]   ;;  %s2462_s6 = inlined_call_operand.hbm [shape: f32[16,512], index: 6, kind: output, shape index: {}]  }
   0x1   :  { %2478 = sst [smem:[#allocation23_spill]] %s2456_s0 }
   0x2   :  { %2479 = sst [smem:[#allocation24_spill]] %s2457_s1 }
   0x3   :  { %2480 = sst [smem:[#allocation25_spill]] %s2458_s2 }
   0x4   :  { %2481 = sst [smem:[#allocation26_spill]] %s2459_s3 }
   0x5   :  { %2482 = sst [smem:[#allocation27_spill]] %s2460_s4 }
   0x6   :  { %2483 = sst [smem:[#allocation28_spill]] %s2461_s5 }
   0x7   :  { %2484 = sst [smem:[#allocation29_spill]] %s2462_s6 }
   0x8   :  { %11 = vsyncpa [#allocation8], 0 }
   0x9   :  { %12 = vsyncpa [#allocation11], 0 }
   0xa   :  { %14 = vsyncpa [#allocation11 + $0x1], 0 }
   0xb   :  { %15 = vsyncpa [#allocation9], 0 }
   0xc   :  { %17 = vsyncpa [#allocation9 + $0x1], 0  ;;  %s2043_s21 = smov 0   ;;  %s2045_s22 = smov 0  }
   0xd   :  { %s2047_s23 = smov 0   ;;  %s2049_s24 = smov 0  }
   0xe   :  { %s2051_s25 = smov 0   ;;  %s2053_s26 = smov 0  }
   0xf   :  { %s2055_s27 = smov 0   ;;  %s2057_s28 = smov 0  }
  0x10   :  { %s2059_s29 = smov 0   ;;  %s2061_s30 = smov 0  }
  0x11   :  { %s2063_s7 = smov 0   ;;  %s2065_s8 = smov 0  }
  0x12   :  { %s2067_s9 = smov 0  }
  0x13 LB: > { %2485 = sst [smem:[#allocation16_spill]] %s1941_s21  ;;  %s1361_s10 = sadd.s32 4294967295, %s1989_s9   ;;  %s1989_s9 = sphi %s2067_s9, %s2540_s9   ;;  %s1985_s8 = sphi %s2065_s8, %s2539_s8   ;;  %s1981_s7 = sphi %s2063_s7, %s2538_s7   ;;  %s1977_s30 = sphi %s2061_s30, %s2537_s30   ;;  %s1973_s29 = sphi %s2059_s29, %s2536_s29   ;;  %s1969_s28 = sphi %s2057_s28, %s2527_s28   ;;  %s1965_s27 = sphi %s2055_s27, %s2526_s27   ;;  %s1961_s26 = sphi %s2053_s26, %s2535_s26   ;;  %s1957_s25 = sphi %s2051_s25, %s2534_s25   ;;  %s1953_s24 = sphi %s2049_s24, %s2533_s24   ;;  %s1949_s23 = sphi %s2047_s23, %s2532_s23   ;;  %s1945_s22 = sphi %s2045_s22, %s2531_s22   ;;  %s1941_s21 = sphi %s2043_s21, %s2530_s21  }
  0x14   : > { %2486 = sst [smem:[#allocation17_spill]] %s1969_s28  ;;  %s1362_s11 = sadd.s32 4294967294, %s1989_s9  }
  0x15   : > { %2487 = sst [smem:[#allocation18_spill]] %s1977_s30  ;;  %p145_p0 = scmp.ne.s32.totalorder %s1961_s26, %s1957_s25 }
  0x16   : > { %2488 = sst [smem:[#allocation19_spill]] %s1981_s7  ;;  %p146_p1 = scmp.eq.s32.totalorder %s1989_s9, 0 }
  0x17   : > { %2489 = sst [smem:[#allocation20_spill]] %s1989_s9  ;;  %p151_p2 = scmp.ne.s32.totalorder %s1957_s25, %s1953_s24 }
  0x18   : > { %p2113_p3 = scmp.eq.s32.totalorder %s1361_s10, 0  ;;  %p2118_p4 = por %p146_p1, %p145_p0 }
  0x19   : > { %p204_p5 = scmp.ne.s32.totalorder %s1949_s23, %s1945_s22  ;;  %p205_p7 = scmp.eq.s32.totalorder %s1361_s10, 7 }
  0x1a   : > { %p2126_p6 = por %p2113_p3, %p151_p2  ;;  %p210_p8 = scmp.ne.s32.totalorder %s1945_s22, %s1941_s21 }
  0x1b   : > { %p211_p9 = scmp.eq.s32.totalorder %s1362_s11, 7  ;;  %p2132_p10 = por %p205_p7, %p204_p5 }
  0x1c   : > { %s2492_s16 = scalar_select %p2126_p6, 1, 0 }
  0x1d   : > { %s2493_s17 = scalar_select %p2132_p10, 1, 0 }
  0x1e   : > { %p1363_p11 = scmp.ge.s32.totalorder %s1989_s9, 1  ;;  %p2137_p12 = por %p211_p9, %p210_p8 }
  0x1f   : > { %2494 = sst [smem:[#allocation21_spill]] %s2493_s17  ;;  %p218_p13 = scmp.lt.s32.totalorder %s1989_s9, 9 }
  0x20   : > { %s2495_s18 = scalar_select %p2137_p12, 1, 0 }
  0x21   : > { %p2142_p0 = pnand %p1363_p11, %p218_p13  ;;  %s1991_s20 = smov [#allocation7]  }
  0x22   : > { %2496 = sst [smem:[#allocation22_spill]] %s2495_s18  ;;  %s230_s24 = sshll.u32 %s1991_s20, 4  ;;  %s231_s24 = int_to_ptr.vmem [resolvable:$true] %s230_s24 }
  0x23   : > { %s2497_s19 = scalar_select %p2142_p0, 1, 0 }
  0x24   : > { %p1514_p1 = pneg %p2142_p0  ;;  %p1527_p2 = scmp.lt.s32.totalorder %s1989_s9, 8 }
  0x25   : > { %s1806_s14 = scalar_lea.vmem %s231_s24, 4096  ;;  %p1814_p12 = scmp.lt.s32.totalorder %s231_s24, %s231_s24 }
  0x26   : > { %p2151_p5 = pnand %p1514_p1, %p2113_p3  ;;  %p2157_p7 = pnand %p1527_p2, %p2118_p4 }
  0x27   : > { %p1807_p9 = scmp.ne.s32.totalorder %s231_s24, %s1806_s14  ;;  %p1815_p10 = scmp.lt.s32.totalorder %s1806_s14, %s1806_s14 }
  0x28   : > { %p1797_p8 = pneg %p2151_p5 }
  0x29   : > { %p1816_p6 = por %p1815_p10, %p1814_p12 }
  0x2a   : > { %p1809_p11 = pnand %p1807_p9, %p1797_p8 }
  0x2c   : > { %p1810_p13 = pneg %p1809_p11 }
  0x2e   : > { %p1817_p0 = pnand %p1816_p6, %p1810_p13 }
  0x30   : > { %1820 = shalt.err (!%p1817_p0)
}
  0x31   : > { %s2473_s20 = smov 256   ;;  %s1993_s15 = smov 16  }
  0x32   : > { %s2500_s1 = sld [smem:[#allocation24_spill]]  ;;  %s35_s18 = sadd.s32 1, %s1977_s30 }
  0x33   : > { %s38_s21 = sadd.s32 1, %s1981_s7  ;;  %p36_p4 = scmp.ge.s32.totalorder %s35_s18, 2 }
  0x34   : > { %s42_s9 = sadd.s32 1, %s1985_s8  ;;  %s187_s6 = smul.u32 %s1977_s30, %s1981_s7 }
  0x35   : > { %s257_s17 = sand.u32 1, %s1961_s26   ;;  %s2542_s18 = smov (%p36_p4, %s35_s18), 0 }
  0x36   : > { %s2544_s21 = smov (!%p36_p4, %s38_s21), %s1981_s7  ;;  %s135_s10 = ssub.s32 %s1977_s30, %s2542_s18 }
  0x37   : > { %p40_p6 = scmp.ge.s32.totalorder %s2544_s21, 2  ;;  %p136_p10 = scmp.eq.s32.totalorder %s135_s10, 0 }
  0x38   : > { %1517 = dma.hbm_to_vmem [thread:$0]  (!%p2151_p5), %s2500_s1, 4096, %s231_s24, [#allocation8], %s2473_s20, %s2473_s20, %s1993_s15  }
  0x39   : > { %s1366_s12 = sshll.u32 %s257_s17, 7  ;;  %s1445_s14 = sshll.u32 %s1977_s30, 7 }
  0x3a   : > { %s2546_s21 = smov (%p40_p6, %s2544_s21), 0  ;;  %s2548_s9 = smov (!%p40_p6, %s42_s9), %s1985_s8 }
  0x3b   : > { %s2501_s24 = sadd.s32 1, %s1961_s26  ;;  %p44_p12 = scmp.ge.s32.totalorder %s2548_s9, 2 }
  0x3c   : > { %s2188_s15 = scalar_select %p136_p10, %s1961_s26, %s2501_s24  }
  0x3d   : > { %s188_s20 = smul.u32 %s2546_s21, %s2542_s18  ;;  %s2502_s4 = sld [smem:[#allocation27_spill]] }
  0x3e   : > { %s2550_s9 = smov (%p44_p12, %s2548_s9), 0  ;;  %s261_s30 = scalar_lea.vmem [#allocation10], %s1366_s12 }
  0x3f   : > { %s190_s10 = ssub.s32 %s187_s6, %s188_s20  ;;  %s268_s3 = sshll.u32 %s261_s30, 4  ;;  %s269_s3 = int_to_ptr.vmem [resolvable:$true] %s268_s3 }
  0x40   : > { %s189_s5 = ssub.s32 %s1985_s8, %s2550_s9  ;;  %s258_s28 = scalar_lea.sflag [#allocation11], %s257_s17 }
  0x41   : > { %s191_s0 = sor.u32 %s190_s10, %s189_s5  ;;  %p1823_p1 = pneg %p2157_p7 }
  0x42   : > { %p192_p0 = scmp.eq.s32.totalorder %s191_s0, 0  ;;  %s1834_s24 = scalar_lea.vmem %s269_s3, 2048 }
  0x43   : > { %s2195_s7 = scalar_lea.hbm %s2502_s4, %s1445_s14  ;;  %p1835_p2 = scmp.ne.s32.totalorder %s269_s3, %s1834_s24 }
  0x44   : > { %s1994_s1 = smov [#allocation10]  }
  0x45   : > { %p1837_p5 = pnand %p1835_p2, %p1823_p1  ;;  %s1839_s2 = sshll.u32 %s1994_s1, 4  ;;  %s1840_s2 = int_to_ptr.vmem [resolvable:$false] %s1839_s2 }
  0x46   : > { %s1841_s14 = scalar_lea.vmem %s1840_s2, 4096  ;;  %p1842_p9 = scmp.lt.s32.totalorder %s269_s3, %s1840_s2 }
  0x47   : > { %p1838_p8 = pneg %p1837_p5  ;;  %p1843_p11 = scmp.lt.s32.totalorder %s1841_s14, %s1834_s24 }
  0x49   : > { %p1844_p13 = por %p1843_p11, %p1842_p9 }
  0x4b   : > { %p1845_p4 = pnand %p1844_p13, %p1838_p8 }
  0x4d   : > { %1848 = shalt.err (!%p1845_p4)
}
  0x4e   : > { %s1995_s6 = smov 128   ;;  %s1996_s5 = smov 8  }
  0x4f   : > { %s2503_s30 = smov 256   ;;  %s2504_s17 = sadd.s32 1, %s1949_s23 }
  0x50   : > { %1521 = dma.hbm_to_vmem [thread:$0]  (!%p2157_p7), %s2195_s7, 2048, %s269_s3, %s258_s28, %s2503_s30, %s1995_s6, %s1996_s5  }
  0x51   : > { %s2211_s20 = scalar_select %p192_p0, %s1949_s23, %s2504_s17  }
  0x52   : > { %p2505_p6 = scmp.ne.s32.totalorder %s2497_s19, 0 }
  0x54   : > { %288 = sbr.rel (%p2505_p6) target bundleno = 1692 (0x69c), region = 44 }
  0x59   : > { %1928 = dma.done.wait (%p2113_p3), [#allocation8], 4096  }
  0x5a   : > { %1930 = vsyncadd (%p2113_p3), [#allocation8], 4294963200  ;;  %s294_s12 = sand.u32 1, %s1957_s25   ;;  %p2506_p7 = scmp.ne.s32.totalorder %s2492_s16, 0 }
  0x5b   : > { %s1371_s10 = sshll.u32 %s294_s12, 7  ;;  %s295_s11 = scalar_lea.sflag [#allocation11], %s294_s12 }
  0x5c   : > { %s2220_s24 = scalar_lea.vmem [#allocation10], %s1371_s10 }
  0x5d   : > { %1932 = dma.done.wait (%p2506_p7), %s295_s11, 2048  }
  0x5e   : > { %1934 = vsyncadd (%p2506_p7), %s295_s11, 4294965248  ;;  %s2507_s0 = sld [smem:[#allocation17_spill]]  ;;  %s332_s3 = sand.u32 1, %s1945_s22  }
  0x5f   : > { %p335_p3 = scmp.lt.s32.totalorder %s1973_s29, 1  ;;  %s1372_s28 = sshll.u32 %s332_s3, 4 }
  0x60   : > { %s1374_s7 = sshll.u32 %s1965_s27, 1  ;;  %s2508_s2 = sld [smem:[#allocation23_spill]] }
  0x61   : > { %p341_p10 = scmp.lt.s32.totalorder %s1374_s7, 3  ;;  %s2509_s30 = sld [smem:[#allocation28_spill]] }
  0x62   : > { %s336_s13 = scalar_select %p335_p3, %s1973_s29, 1 }
  0x63   : > { %s2552_s7 = smov (!%p341_p10, %s1374_s7), 3  ;;  %p349_p0 = scmp.eq.s32.totalorder %s1965_s27, 0 }
  0x64   : > { %s1373_s16 = sshll.u32 %s336_s13, 2  ;;  %p348_p12 = scmp.eq.s32.totalorder %s2507_s0, 0 }
  0x65   : > { %s2247_s12 = scalar_lea.vmem [#allocation12], %s1372_s28 }
  0x66   : > { %s2238_s14 = scalar_lea.vmem %s2508_s2, %s1373_s16  ;;  %p350_p1 = pnand %p349_p0, %p348_p12 }
  0x67   : > { %s343_s17 = scalar_lea.vmem %s2509_s30, %s2552_s7  ;;  %s2510_s0 = sld [smem:[#allocation26_spill]] (!%p350_p1) }
  0x68   : > { %353 = sbr.rel (%p350_p1) target bundleno = 681 (0x2a9), region = 56  ;;  %s2511_s1 = sld [smem:[#allocation25_spill]] (!%p350_p1) }
  0x6d   : > { %v1649_v0 = vld [vmem:[#allocation7 + $0xe4] ss:$16 sps:$4 sm:$0xff]   ;;  %v1651_v1 = vld [vmem:[#allocation7 + $0xe0] ss:$16 sps:$4 sm:$0xff]   ;;  %v1997_v2 = vmov 0   ;;  %vm792_vm0 = vcmask 7168   ;;  %v389_v44 = vlaneseq }
  0x6e   : > { %601 = vmatprep.mubr.bf16.mxu0 %v1997_v2  ;;  %642 = vmatprep.mubr.bf16.mxu1 %v1997_v2  ;;  %v1652_v3 = vld [vmem:[#allocation7 + $0xc4] ss:$16 sps:$4 sm:$0xff]   ;;  %v1998_v4 = vmov -inf   ;;  %v1999_v5 = vmov 0.0   ;;  %v1654_v6 = vld [vmem:[#allocation7 + $0xc0] ss:$16 sps:$4 sm:$0xff]  }
  0x6f   : > { %569 = vmatprep.subr.bf16.mxu0 %v1649_v0  ;;  %793 = vst.msk [vmem:[#allocation4] sm:$0xff] %vm792_vm0, %v1998_v4  ;;  %794 = vst.msk [vmem:[#allocation4 + $0x8] sm:$0xff] %vm792_vm0, %v1998_v4  ;;  %v1655_v7 = vld [vmem:[#allocation7 + $0xa4] ss:$16 sps:$4 sm:$0xff]   ;;  %v1657_v8 = vld [vmem:[#allocation7 + $0xa0] ss:$16 sps:$4 sm:$0xff]  }
  0x70   : > { %795 = vst.msk [vmem:[#allocation4 + $0x10] sm:$0xff] %vm792_vm0, %v1998_v4  ;;  %796 = vst.msk [vmem:[#allocation4 + $0x18] sm:$0xff] %vm792_vm0, %v1998_v4  ;;  %570 = vmatpush1.bf16.msra.mxu0 %v1651_v1  ;;  %v1658_v9 = vld [vmem:[#allocation7 + $0x84] ss:$16 sps:$4 sm:$0xff]   ;;  %v1660_v10 = vld [vmem:[#allocation7 + $0x80] ss:$16 sps:$4 sm:$0xff]  }
  0x71   : > { %797 = vst.msk [vmem:[#allocation5] sm:$0xff] %vm792_vm0, %v1999_v5  ;;  %798 = vst.msk [vmem:[#allocation5 + $0x8] sm:$0xff] %vm792_vm0, %v1999_v5  ;;  %571 = vmatprep.subr.bf16.mxu0 %v1652_v3  ;;  %v1661_v11 = vld [vmem:[#allocation7 + $0x64] ss:$16 sps:$4 sm:$0xff]   ;;  %v1663_v12 = vld [vmem:[#allocation7 + $0x60] ss:$16 sps:$4 sm:$0xff]  }
  0x72   : > { %799 = vst.msk [vmem:[#allocation5 + $0x10] sm:$0xff] %vm792_vm0, %v1999_v5  ;;  %800 = vst.msk [vmem:[#allocation5 + $0x18] sm:$0xff] %vm792_vm0, %v1999_v5  ;;  %v1664_v13 = vld [vmem:[#allocation7 + $0x44] ss:$16 sps:$4 sm:$0xff]   ;;  %v1666_v14 = vld [vmem:[#allocation7 + $0x40] ss:$16 sps:$4 sm:$0xff]  }
  0x73   : > { %v1667_v15 = vld [vmem:[#allocation7 + $0x24] ss:$16 sps:$4 sm:$0xff]   ;;  %v1669_v16 = vld [vmem:[#allocation7 + $0x20] ss:$16 sps:$4 sm:$0xff]   ;;  %v354_v19 = vld [vmem:[%s2238_s14] sm:$0xf] }
  0x74   : > { %572 = vmatpush1.bf16.msra.mxu0 %v1654_v6  ;;  %v1670_v17 = vld [vmem:[#allocation7 + $0x4] ss:$16 sps:$4 sm:$0xff]   ;;  %v1672_v18 = vld [vmem:[#allocation7] ss:$16 sps:$4 sm:$0xff]   ;;  %v1674_v21 = vld [vmem:[%s2510_s0 + $0x30] sm:$0xff]   ;;  %vm2000_vm1 = vmmov 0  }
  0x75   : > { %573 = vmatprep.subr.bf16.mxu0 %v1655_v7  ;;  %v1673_v20 = vld [vmem:[%s2510_s0 + $0x38] sm:$0xff]   ;;  %v1675_v22 = vld [vmem:[%s2510_s0 + $0x28] sm:$0xff]   ;;  %v1676_v23 = vld [vmem:[%s2510_s0 + $0x20] sm:$0xff]   ;;  %v390_v45 = vshrl.u32 %v389_v44, 7  ;;  %vm779_vm2 = vcmask 31744  }
  0x76   : > { %v1677_v24 = vld [vmem:[%s2510_s0 + $0x18] sm:$0xff]   ;;  %v1678_v25 = vld [vmem:[%s2510_s0 + $0x10] sm:$0xff]   ;;  %v1679_v26 = vld [vmem:[%s2510_s0 + $0x8] sm:$0xff]  }
  0x77   : > { %v1680_v27 = vld [vmem:[%s2510_s0] sm:$0xff]   ;;  %v391_v46 = vsub.s32 0, %v390_v45  ;;  %v395_v48 = vsub.s32 1, %v390_v45  ;;  %v399_v1 = vsub.s32 2, %v390_v45  ;;  %v403_v2 = vsub.s32 3, %v390_v45 }
  0x78   : > { %574 = vmatpush1.bf16.msra.mxu0 %v1657_v8  ;;  %v1681_v28 = vld [vmem:[#allocation7 + $0xec] ss:$16 sps:$4 sm:$0xff]   ;;  %v1683_v29 = vld [vmem:[#allocation7 + $0xe8] ss:$16 sps:$4 sm:$0xff]  }
  0x79   : > { %575 = vmatprep.subr.bf16.mxu0 %v1658_v9  ;;  %v1684_v30 = vld [vmem:[#allocation7 + $0xcc] ss:$16 sps:$4 sm:$0xff]   ;;  %610 = vmatprep.subr.bf16.mxu1 %v1681_v28  ;;  %v1686_v31 = vld [vmem:[#allocation7 + $0xc8] ss:$16 sps:$4 sm:$0xff]  }
  0x7a   : > { %611 = vmatpush1.bf16.msra.mxu1 %v1683_v29  ;;  %v1687_v32 = vld [vmem:[#allocation7 + $0xac] ss:$16 sps:$4 sm:$0xff]   ;;  %v1689_v33 = vld [vmem:[#allocation7 + $0xa8] ss:$16 sps:$4 sm:$0xff]  }
  0x7b   : > { %612 = vmatprep.subr.bf16.mxu1 %v1684_v30  ;;  %v1690_v34 = vld [vmem:[#allocation7 + $0x8c] ss:$16 sps:$4 sm:$0xff]   ;;  %v1692_v35 = vld [vmem:[#allocation7 + $0x88] ss:$16 sps:$4 sm:$0xff]  }
  0x7c   : > { %576 = vmatpush1.bf16.msra.mxu0 %v1660_v10  ;;  %v1693_v36 = vld [vmem:[#allocation7 + $0x6c] ss:$16 sps:$4 sm:$0xff]   ;;  %v1695_v37 = vld [vmem:[#allocation7 + $0x68] ss:$16 sps:$4 sm:$0xff]  }
  0x7d   : > { %577 = vmatprep.subr.bf16.mxu0 %v1661_v11  ;;  %v1696_v38 = vld [vmem:[#allocation7 + $0x4c] ss:$16 sps:$4 sm:$0xff]   ;;  %v1698_v39 = vld [vmem:[#allocation7 + $0x48] ss:$16 sps:$4 sm:$0xff]  }
  0x7e   : > { %613 = vmatpush1.bf16.msra.mxu1 %v1686_v31  ;;  %v1699_v40 = vld [vmem:[#allocation7 + $0x2c] ss:$16 sps:$4 sm:$0xff]   ;;  %v1701_v41 = vld [vmem:[#allocation7 + $0x28] ss:$16 sps:$4 sm:$0xff]  }
  0x7f   : > { %614 = vmatprep.subr.bf16.mxu1 %v1687_v32  ;;  %v1702_v42 = vld [vmem:[#allocation7 + $0xc] ss:$16 sps:$4 sm:$0xff]   ;;  %v1704_v43 = vld [vmem:[#allocation7 + $0x8] ss:$16 sps:$4 sm:$0xff]  }
  0x80   : > { %578 = vmatpush1.bf16.msra.mxu0 %v1663_v12  ;;  %v387_v47 = vld [vmem:[%s2511_s1] sm:$0xf] }
  0x81   : > { %579 = vmatprep.subr.bf16.mxu0 %v1664_v13  ;;  %v392_v49 = vrot.slane %v387_v47, %v391_v46  ;;  %v396_v50 = vrot.slane %v387_v47, %v395_v48  ;;  %v400_v3 = vrot.slane %v387_v47, %v399_v1  ;;  %v404_v4 = vrot.slane %v387_v47, %v403_v2 }
  0x82   : > { %615 = vmatpush1.bf16.msra.mxu1 %v1689_v33 }
  0x83   : > { %616 = vmatprep.subr.bf16.mxu1 %v1690_v34 }
  0x84   : > { %580 = vmatpush1.bf16.msra.mxu0 %v1666_v14 }
  0x85   : > { %581 = vmatprep.subr.bf16.mxu0 %v1667_v15 }
  0x86   : > { %617 = vmatpush1.bf16.msra.mxu1 %v1692_v35 }
  0x87   : > { %618 = vmatprep.subr.bf16.mxu1 %v1693_v36 }
  0x88   : > { %582 = vmatpush1.bf16.msra.mxu0 %v1669_v16 }
  0x89   : > { %583 = vmatprep.subr.bf16.mxu0 %v1670_v17 }
  0x8a   : > { %619 = vmatpush1.bf16.msra.mxu1 %v1695_v37 }
  0x8b   : > { %620 = vmatprep.subr.bf16.mxu1 %v1696_v38 }
  0x8c   : > { %584 = vmatpush1.bf16.msra.mxu0 %v1672_v18 }
  0x8d   : > { %1470 = vmatprep.subr.bf16.mxu0 %v1999_v5 }
  0x8e   : > { %621 = vmatpush1.bf16.msra.mxu1 %v1698_v39 }
  0x8f   : > { %602 = vmatmul.mubr.bf16.vlgmr.msra.gmra.mxu0 %v354_v19  ;;  %622 = vmatprep.subr.bf16.mxu1 %v1699_v40 }
  0x90   : > { %1471 = vmatpush3.bf16.msra.mxu0 %v1673_v20  ;;  %1486 = vmatprep.mubr.msk.bf16.mxu0 %vm2000_vm1, %v1999_v5 }
  0x91   : > { %1472 = vmatprep.subr.bf16.mxu0 %v1999_v5 }
  0x92   : > { %623 = vmatpush1.bf16.msra.mxu1 %v1701_v41 }
  0x93   : > { %624 = vmatprep.subr.bf16.mxu1 %v1702_v42 }
  0x94   : > { %1473 = vmatpush3.bf16.msra.mxu0 %v1674_v21 }
  0x95   : > { %1474 = vmatprep.subr.bf16.mxu0 %v1999_v5 }
  0x96   : > { %625 = vmatpush1.bf16.msra.mxu1 %v1704_v43 }
  0x98   : > { %1475 = vmatpush3.bf16.msra.mxu0 %v1675_v22 }
  0x99   : > { %1476 = vmatprep.subr.bf16.mxu0 %v1999_v5  ;;  %643 = vmatmul.mubr.bf16.vlgmr.msra.gmra.mxu1 %v354_v19 }
  0x9c   : > { %1477 = vmatpush3.bf16.msra.mxu0 %v1676_v23 }
  0x9d   : > { %1478 = vmatprep.subr.bf16.mxu0 %v1999_v5 }
  0xa0   : > { %1479 = vmatpush3.bf16.msra.mxu0 %v1677_v24 }
  0xa1   : > { %1480 = vmatprep.subr.bf16.mxu0 %v1999_v5 }
  0xa4   : > { %1481 = vmatpush3.bf16.msra.mxu0 %v1678_v25 }
  0xa5   : > { %1482 = vmatprep.subr.bf16.mxu0 %v1999_v5 }
  0xa8   : > { %1483 = vmatpush3.bf16.msra.mxu0 %v1679_v26 }
  0xa9   : > { %1484 = vmatprep.subr.bf16.mxu0 %v1999_v5 }
  0xac   : > { %1485 = vmatpush3.bf16.msra.mxu0 %v1680_v27 }
  0xaf   : > { %1487 = vmatmul.mubr.bf16.vlgmr.msra.gmra.mxu0 %v354_v19 }
 0x14f   : > { %v603_v51 = vpop.f32.mrf.mxu0 }
 0x150   : > { %v604_v52 = vadd.f32 %v603_v51, %v392_v49 }
 0x151   : > { %v605_v53 = vpop.f32.mrf.mxu0 }
 0x152   : > { %1705 = vtanh.f32 %v604_v52  ;;  %v606_v54 = vadd.f32 %v605_v53, %v396_v50 }
 0x153   : > { %v607_v55 = vpop.f32.mrf.mxu0 }
 0x154   : > { %1707 = vtanh.f32 %v606_v54 }
 0x155   : > { %v608_v56 = vpop.f32.mrf.mxu0 }
 0x159   : > { %v644_v5 = vpop.f32.mrf.mxu1 }
 0x15a   : > { %v645_v6 = vadd.f32 %v644_v5, %v400_v3 }
 0x15b   : > { %v646_v7 = vpop.f32.mrf.mxu1 }
 0x15c   : > { %1709 = vtanh.f32 %v645_v6  ;;  %v647_v8 = vadd.f32 %v646_v7, %v404_v4 }
 0x15d   : > { %v648_v9 = vpop.f32.mrf.mxu1 }
 0x15e   : > { %1711 = vtanh.f32 %v647_v8 }
 0x15f   : > { %v1706_v57 = vpop.eup %1705  ;;  %v649_v10 = vpop.f32.mrf.mxu1 }
 0x161   : > { %v1708_v58 = vpop.eup %1707 }
 0x162   : > { %v1453_v59 = vpack.c.bf16 %v1708_v58, %v1706_v57 }
 0x164   : > { %1454 = vst [vmem:[#allocation2] sm:$0xff] %v1453_v59  }
 0x169   : > { %v1710_v11 = vpop.eup %1709 }
 0x16b   : > { %v1712_v12 = vpop.eup %1711 }
 0x16c   : > { %v1458_v13 = vpack.c.bf16 %v1712_v12, %v1710_v11 }
 0x16e   : > { %1460 = vst [vmem:[#allocation2 + $0x8] sm:$0xff] %v1458_v13  }
 0x16f   : > { %v773_v60 = vpop.f32.mrf.mxu0 }
 0x170   : > { %v780_v61 = vsel %vm779_vm2, %v773_v60, -inf }
 0x171   : > { %781 = vmax.xlane.f32.xlu0 %v780_v61  ;;  %v1488_v62 = vpop.f32.mrf.mxu0 }
 0x173   : > { %v776_v63 = vpop.f32.mrf.mxu0 }
 0x175   : > { %v1489_v0 = vpop.f32.mrf.mxu0 }
 0x1fa   : > { %v782_v14 = vpop.xlane.xlu0 %781 }
 0x1fb   : > { %v783_v15 = vsub.f32 %v773_v60, %v782_v14 }
 0x1fd   : > { %v784_v16 = vmul.f32 1.442695, %v783_v15 }
 0x1ff   : > { %1713 = vpow2.f32 %v784_v16 }
 0x20c   : > { %v1714_v17 = vpop.eup %1713 }
 0x20d   : > { %v786_v18 = vsel %vm779_vm2, %v1714_v17, 0.0 }
 0x20e   : > { %787 = vadd.xlane.f32.xlu0 %v786_v18 }
 0x297   : > { %v788_v19 = vpop.xlane.xlu0 %787 }
 0x298   : > { %1715 = vrcp.f32 %v788_v19 }
 0x2a5   : > { %v1716_v20 = vpop.eup %1715 }
 0x2a6   : > { %v790_v21 = vmul.f32 %v1716_v20, %v1714_v17 }
 0x2a8   : > { %791 = vst.msk [vmem:[#allocation3] sm:$0xff] %vm779_vm2, %v790_v21 }
 0x2a9 PF: > { %v1717_v22 = vld [vmem:[%s2220_s24 + $0x74] ss:$8 sps:$4 sm:$0xff]   ;;  %v1719_v23 = vld [vmem:[%s2220_s24 + $0x70] ss:$8 sps:$4 sm:$0xff]   ;;  %v2001_v24 = vmov 0   ;;  %v1741_v39 = vld [vmem:[#allocation2] sm:$0xff]   ;;  %v823_v41 = vlaneseq }
 0x2aa   : > { %957 = vmatprep.mubr.bf16.mxu0 %v2001_v24  ;;  %967 = vmatprep.mubr.bf16.mxu1 %v2001_v24  ;;  %v1720_v25 = vld [vmem:[%s2220_s24 + $0x64] ss:$8 sps:$4 sm:$0xff]   ;;  %v1722_v26 = vld [vmem:[%s2220_s24 + $0x60] ss:$8 sps:$4 sm:$0xff]   ;;  %v1723_v27 = vld [vmem:[%s2220_s24 + $0x54] ss:$8 sps:$4 sm:$0xff]  }
 0x2ab   : > { %925 = vmatprep.subr.bf16.mxu0 %v1717_v22  ;;  %1490 = vmatprep.subr.bf16.mxu1 %v1717_v22  ;;  %v1725_v28 = vld [vmem:[%s2220_s24 + $0x50] ss:$8 sps:$4 sm:$0xff]   ;;  %v1726_v29 = vld [vmem:[%s2220_s24 + $0x44] ss:$8 sps:$4 sm:$0xff]   ;;  %v1728_v30 = vld [vmem:[%s2220_s24 + $0x40] ss:$8 sps:$4 sm:$0xff]  }
 0x2ac   : > { %926 = vmatpush1.bf16.msra.mxu0 %v1719_v23  ;;  %1498 = vmatpush1.bf16.msra.mxu1 %v1719_v23  ;;  %v1729_v31 = vld [vmem:[%s2220_s24 + $0x34] ss:$8 sps:$4 sm:$0xff]   ;;  %v1731_v32 = vld [vmem:[%s2220_s24 + $0x30] ss:$8 sps:$4 sm:$0xff]   ;;  %v1732_v33 = vld [vmem:[%s2220_s24 + $0x24] ss:$8 sps:$4 sm:$0xff]  }
 0x2ad   : > { %927 = vmatprep.subr.bf16.mxu0 %v1720_v25  ;;  %1491 = vmatprep.subr.bf16.mxu1 %v1720_v25  ;;  %v1734_v34 = vld [vmem:[%s2220_s24 + $0x20] ss:$8 sps:$4 sm:$0xff]   ;;  %v1735_v35 = vld [vmem:[%s2220_s24 + $0x14] ss:$8 sps:$4 sm:$0xff]   ;;  %v1737_v36 = vld [vmem:[%s2220_s24 + $0x10] ss:$8 sps:$4 sm:$0xff]  }
 0x2ae   : > { %v1738_v37 = vld [vmem:[%s2220_s24 + $0x4] ss:$8 sps:$4 sm:$0xff]   ;;  %v1740_v38 = vld [vmem:[%s2220_s24] ss:$8 sps:$4 sm:$0xff]   ;;  %v1742_v40 = vld [vmem:[#allocation2 + $0x8] sm:$0xff]   ;;  %v824_v42 = vshrl.u32 %v823_v41, 7 }
 0x2af   : > { %v821_v44 = vld [vmem:[%s343_s17] sm:$0x3]  ;;  %s2513_s24 = sld [smem:[#allocation17_spill]] }
 0x2b0   : > { %928 = vmatpush1.bf16.msra.mxu0 %v1722_v26  ;;  %1499 = vmatpush1.bf16.msra.mxu1 %v1722_v26  ;;  %v825_v43 = vsub.s32 0, %v824_v42  ;;  %v829_v45 = vsub.s32 1, %v824_v42 }
 0x2b1   : > { %929 = vmatprep.subr.bf16.mxu0 %v1723_v27  ;;  %1492 = vmatprep.subr.bf16.mxu1 %v1723_v27 }
 0x2b2   : > { %v826_v46 = vrot.slane %v821_v44, %v825_v43  ;;  %v830_v47 = vrot.slane %v821_v44, %v829_v45 }
 0x2b4   : > { %930 = vmatpush1.bf16.msra.mxu0 %v1725_v28  ;;  %1500 = vmatpush1.bf16.msra.mxu1 %v1725_v28 }
 0x2b5   : > { %931 = vmatprep.subr.bf16.mxu0 %v1726_v29  ;;  %1493 = vmatprep.subr.bf16.mxu1 %v1726_v29  ;;  %p1437_p2 = scmp.ne.s32.totalorder %s2513_s24, 0 }
 0x2b8   : > { %932 = vmatpush1.bf16.msra.mxu0 %v1728_v30  ;;  %1501 = vmatpush1.bf16.msra.mxu1 %v1728_v30 }
 0x2b9   : > { %933 = vmatprep.subr.bf16.mxu0 %v1729_v31  ;;  %1494 = vmatprep.subr.bf16.mxu1 %v1729_v31 }
 0x2bc   : > { %934 = vmatpush1.bf16.msra.mxu0 %v1731_v32  ;;  %1502 = vmatpush1.bf16.msra.mxu1 %v1731_v32 }
 0x2bd   : > { %935 = vmatprep.subr.bf16.mxu0 %v1732_v33  ;;  %1495 = vmatprep.subr.bf16.mxu1 %v1732_v33 }
 0x2c0   : > { %936 = vmatpush1.bf16.msra.mxu0 %v1734_v34  ;;  %1503 = vmatpush1.bf16.msra.mxu1 %v1734_v34 }
 0x2c1   : > { %937 = vmatprep.subr.bf16.mxu0 %v1735_v35  ;;  %1496 = vmatprep.subr.bf16.mxu1 %v1735_v35 }
 0x2c4   : > { %938 = vmatpush1.bf16.msra.mxu0 %v1737_v36  ;;  %1504 = vmatpush1.bf16.msra.mxu1 %v1737_v36 }
 0x2c5   : > { %939 = vmatprep.subr.bf16.mxu0 %v1738_v37  ;;  %1497 = vmatprep.subr.bf16.mxu1 %v1738_v37 }
 0x2c8   : > { %940 = vmatpush1.bf16.msra.mxu0 %v1740_v38  ;;  %1505 = vmatpush1.bf16.msra.mxu1 %v1740_v38 }
 0x2cb   : > { %958 = vmatmul.mubr.bf16.vlgmr.msra.gmra.mxu0 %v1741_v39  ;;  %968 = vmatmul.mubr.bf16.vlgmr.msra.gmra.mxu1 %v1742_v40 }
 0x38b   : > { %v959_v48 = vpop.f32.mrf.mxu0  ;;  %v969_v49 = vpop.f32.mrf.mxu1 }
 0x38c   : > { %v2301_v50 = vadd.f32 %v959_v48, %v826_v46  ;;  %v2303_v51 = vadd.f32 %v969_v49, %v826_v46 }
 0x38d   : > { %v961_v52 = vpop.f32.mrf.mxu0  ;;  %v971_v53 = vpop.f32.mrf.mxu1 }
 0x38e   : > { %v2305_v54 = vadd.f32 %v961_v52, %v830_v47  ;;  %v2307_v55 = vadd.f32 %v971_v53, %v830_v47  ;;  %980 = sbr.rel (%p1437_p2) target bundleno = 1355 (0x54b), region = 60 }
 0x38f   : > { %v963_v56 = vpop.f32.mrf.mxu0  ;;  %v973_v57 = vpop.f32.mrf.mxu1 }
 0x390   : > { %v2309_v58 = vadd.f32 %v963_v56, %v826_v46  ;;  %v2311_v59 = vadd.f32 %v973_v57, %v826_v46 }
 0x391   : > { %v965_v60 = vpop.f32.mrf.mxu0  ;;  %v975_v61 = vpop.f32.mrf.mxu1 }
 0x392   : > { %v2313_v62 = vadd.f32 %v965_v60, %v830_v47  ;;  %v2315_v63 = vadd.f32 %v975_v61, %v830_v47 }
 0x393   : > { %v989_v0 = vmax.f32 %v2301_v50, %v2305_v54  ;;  %v1035_v1 = vmax.f32 %v2303_v51, %v2307_v55  ;;  %v2002_v4 = vmov 0   ;;  %v2326_v5 = vld [vmem:[#allocation4] sm:$0xff]  ;;  %v2328_v6 = vld [vmem:[#allocation4 + $0x10] sm:$0xff]  ;;  %vm1081_vm3 = vcmask 7168   ;;  %v2336_v11 = vld [vmem:[#allocation4 + $0x8] sm:$0xff] }
 0x394   : > { %v1012_v2 = vmax.f32 %v2309_v58, %v2313_v62  ;;  %v1058_v3 = vmax.f32 %v2311_v59, %v2315_v63  ;;  %1743 = vset.pattern.permute.xlu0 %v2002_v4  ;;  %1744 = vset.pattern.permute.xlu1 %v2002_v4  ;;  %v2338_v12 = vld [vmem:[#allocation4 + $0x18] sm:$0xff] }
 0x395   : > { %990 = vmax.xlane.f32.xlu0 %v989_v0  ;;  %1036 = vmax.xlane.f32.xlu1 %v1035_v1 }
 0x399   : > { %1013 = vmax.xlane.f32.xlu0 %v1012_v2  ;;  %1059 = vmax.xlane.f32.xlu1 %v1058_v3  ;;  %v985_v2 = vld [vmem:[#allocation5] sm:$0xff] }
 0x41e   : > { %v991_v7 = vpop.xlane.xlu0 %990  ;;  %v1037_v8 = vpop.xlane.xlu1 %1036 }
 0x41f   : > { %v2331_v9 = vmax.f32 %v2326_v5, %v991_v7  ;;  %v2334_v10 = vmax.f32 %v2328_v6, %v1037_v8 }
 0x421   : > { %v993_v13 = vsub.f32 %v2326_v5, %v2331_v9  ;;  %1082 = vst.msk [vmem:[#allocation4] sm:$0xff] %vm1081_vm3, %v2331_v9  ;;  %999 = vperm.xlu0 %1743, %v2331_v9   ;;  %v1039_v14 = vsub.f32 %v2328_v6, %v2334_v10  ;;  %1084 = vst.msk [vmem:[#allocation4 + $0x10] sm:$0xff] %vm1081_vm3, %v2334_v10  ;;  %v986_v6 = vld [vmem:[#allocation5 + $0x8] sm:$0xff] }
 0x422   : > { %v1014_v15 = vpop.xlane.xlu0 %1013  ;;  %v1060_v16 = vpop.xlane.xlu1 %1059 }
 0x423   : > { %v1015_v17 = vmax.f32 %v2336_v11, %v1014_v15  ;;  %v1061_v18 = vmax.f32 %v2338_v12, %v1060_v16  ;;  %v994_v57 = vmul.f32 1.442695, %v993_v13  ;;  %v1040_v61 = vmul.f32 1.442695, %v1039_v14  ;;  %v988_v16 = vld [vmem:[#allocation5 + $0x18] sm:$0xff] }
 0x425   : > { %v1016_v19 = vsub.f32 %v2336_v11, %v1015_v17  ;;  %1083 = vst.msk [vmem:[#allocation4 + $0x8] sm:$0xff] %vm1081_vm3, %v1015_v17  ;;  %1022 = vperm.xlu1 %1744, %v1015_v17   ;;  %v1062_v20 = vsub.f32 %v2338_v12, %v1061_v18  ;;  %1085 = vst.msk [vmem:[#allocation4 + $0x18] sm:$0xff] %vm1081_vm3, %v1061_v18  ;;  %v987_v11 = vld [vmem:[#allocation5 + $0x10] sm:$0xff] }
 0x427   : > { %v1017_v60 = vmul.f32 1.442695, %v1016_v19  ;;  %v1063_v0 = vmul.f32 1.442695, %v1062_v20 }
 0x429   : > { %1045 = vperm.xlu1 %1744, %v2334_v10  }
 0x42d   : > { %1068 = vperm.xlu1 %1744, %v1061_v18  }
 0x49c   : > { %v1000_v21 = vpop.permute.xlu0 %999 }
 0x49d   : > { %v1002_v22 = vsub.f32 %v2301_v50, %v1000_v21  ;;  %v1003_v23 = vsub.f32 %v2305_v54, %v1000_v21 }
 0x49f   : > { %v1004_v24 = vmul.f32 1.442695, %v1002_v22  ;;  %v1006_v25 = vmul.f32 1.442695, %v1003_v23 }
 0x4a0   : > { %v1023_v26 = vpop.permute.xlu1 %1022 }
 0x4a1   : > { %1745 = vpow2.f32 %v1004_v24  ;;  %v1025_v27 = vsub.f32 %v2309_v58, %v1023_v26  ;;  %v1026_v28 = vsub.f32 %v2313_v62, %v1023_v26 }
 0x4a2   : > { %1747 = vpow2.f32 %v1006_v25 }
 0x4a3   : > { %v1027_v29 = vmul.f32 1.442695, %v1025_v27  ;;  %v1029_v30 = vmul.f32 1.442695, %v1026_v28 }
 0x4a4   : > { %v1046_v31 = vpop.permute.xlu1 %1045 }
 0x4a5   : > { %1749 = vpow2.f32 %v1027_v29  ;;  %v1048_v32 = vsub.f32 %v2303_v51, %v1046_v31  ;;  %v1049_v33 = vsub.f32 %v2307_v55, %v1046_v31 }
 0x4a6   : > { %1751 = vpow2.f32 %v1029_v30 }
 0x4a7   : > { %v1050_v34 = vmul.f32 1.442695, %v1048_v32  ;;  %v1052_v35 = vmul.f32 1.442695, %v1049_v33 }
 0x4a8   : > { %v1069_v36 = vpop.permute.xlu1 %1068 }
 0x4a9   : > { %1753 = vpow2.f32 %v1050_v34  ;;  %v1071_v37 = vsub.f32 %v2311_v59, %v1069_v36  ;;  %v1072_v38 = vsub.f32 %v2315_v63, %v1069_v36 }
 0x4aa   : > { %1755 = vpow2.f32 %v1052_v35 }
 0x4ab   : > { %v1073_v39 = vmul.f32 1.442695, %v1071_v37  ;;  %v1075_v40 = vmul.f32 1.442695, %v1072_v38 }
 0x4ad   : > { %1757 = vpow2.f32 %v1073_v39 }
 0x4ae   : > { %v1746_v41 = vpop.eup %1745  ;;  %1759 = vpow2.f32 %v1075_v40 }
 0x4af   : > { %v1748_v42 = vpop.eup %1747  ;;  %1761 = vpow2.f32 %v994_v57 }
 0x4b0   : > { %v1008_v43 = vadd.f32 %v1748_v42, %v1746_v41  ;;  %1763 = vpow2.f32 %v1017_v60 }
 0x4b1   : > { %1765 = vpow2.f32 %v1040_v61 }
 0x4b2   : > { %v1750_v44 = vpop.eup %1749  ;;  %1009 = vadd.xlane.f32.xlu1 %v1008_v43  ;;  %1767 = vpow2.f32 %v1063_v0 }
 0x4b3   : > { %v1752_v45 = vpop.eup %1751 }
 0x4b4   : > { %v1031_v46 = vadd.f32 %v1752_v45, %v1750_v44 }
 0x4b6   : > { %v1754_v47 = vpop.eup %1753  ;;  %1032 = vadd.xlane.f32.xlu0 %v1031_v46 }
 0x4b7   : > { %v1756_v48 = vpop.eup %1755 }
 0x4b8   : > { %v1054_v49 = vadd.f32 %v1756_v48, %v1754_v47 }
 0x4ba   : > { %v1758_v52 = vpop.eup %1757  ;;  %1055 = vadd.xlane.f32.xlu1 %v1054_v49 }
 0x4bb   : > { %v1760_v53 = vpop.eup %1759 }
 0x4bc   : > { %v1077_v56 = vadd.f32 %v1760_v53, %v1758_v52  ;;  %v1762_v1 = vpop.eup %1761 }
 0x4bd   : > { %v996_v3 = vmul.f32 %v1762_v1, %v985_v2  ;;  %v1764_v4 = vpop.eup %1763 }
 0x4be   : > { %1078 = vadd.xlane.f32.xlu1 %v1077_v56  ;;  %v1019_v8 = vmul.f32 %v1764_v4, %v986_v6  ;;  %v1766_v9 = vpop.eup %1765 }
 0x4bf   : > { %v1042_v13 = vmul.f32 %v1766_v9, %v987_v11  ;;  %v1768_v14 = vpop.eup %1767 }
 0x4c0   : > { %v1065_v18 = vmul.f32 %v1768_v14, %v988_v16 }
 0x53b   : > { %v1010_v5 = vpop.xlane.xlu1 %1009 }
 0x53c   : > { %v1011_v7 = vadd.f32 %v1010_v5, %v996_v3 }
 0x53e   : > { %1086 = vst.msk [vmem:[#allocation5] sm:$0xff] %vm1081_vm3, %v1011_v7 }
 0x53f   : > { %v1033_v10 = vpop.xlane.xlu0 %1032 }
 0x540   : > { %v1034_v12 = vadd.f32 %v1033_v10, %v1019_v8 }
 0x542   : > { %1087 = vst.msk [vmem:[#allocation5 + $0x8] sm:$0xff] %vm1081_vm3, %v1034_v12 }
 0x543   : > { %v1056_v15 = vpop.xlane.xlu1 %1055 }
 0x544   : > { %v1057_v17 = vadd.f32 %v1056_v15, %v1042_v13 }
 0x546   : > { %1088 = vst.msk [vmem:[#allocation5 + $0x10] sm:$0xff] %vm1081_vm3, %v1057_v17 }
 0x547   : > { %v1079_v19 = vpop.xlane.xlu1 %1078 }
 0x548   : > { %v1080_v20 = vadd.f32 %v1079_v19, %v1065_v18 }
 0x54a   : > { %1089 = vst.msk [vmem:[#allocation5 + $0x18] sm:$0xff] %vm1081_vm3, %v1080_v20 }
 0x54b PF: > { %s2514_s7 = sld [smem:[#allocation17_spill]] }
 0x551   : > { %p1090_p5 = scmp.eq.s32.totalorder %s2514_s7, 1 }
 0x553   : > { %p1091_p8 = pnand %p1090_p5, %p349_p0 }
 0x554   : > { %s2003_s17 = smov (!%p1091_p8), 127   ;;  %s2004_s5 = smov (!%p1091_p8), 125  }
 0x555   : > { %1094 = sbr.rel (%p1091_p8) target bundleno = 1493 (0x5d5), region = 64  ;;  %s2005_s30 = smov (!%p1091_p8), 126  }
 0x55a   : > { %v1095_v21 = vld [vmem:[#allocation3] sm:$0xff]  ;;  %v1096_v22 = vld [vmem:[#allocation5] sm:$0xff]  ;;  %vm1122_vm4 = vcmask 7168   ;;  %v1097_v25 = vld [vmem:[#allocation5 + $0x8] sm:$0xff] }
 0x55b   : > { %1769 = vrcp.f32 %v1096_v22  ;;  %1109 = vrot.lane.b32.xlu0 %v1095_v21, %s2003_s17  ;;  %1115 = vrot.lane.b32.xlu1 %v1095_v21, %s2004_s5  ;;  %v1099_v26 = vld [vmem:[#allocation5 + $0x18] sm:$0xff]  ;;  %v1098_v27 = vld [vmem:[#allocation5 + $0x10] sm:$0xff] }
 0x55c   : > { %1771 = vrcp.f32 %v1097_v25 }
 0x55d   : > { %1773 = vrcp.f32 %v1099_v26 }
 0x55e   : > { %1775 = vrcp.f32 %v1098_v27 }
 0x55f   : > { %1112 = vrot.lane.b32.xlu0 %v1095_v21, %s2005_s30 }
 0x568   : > { %v1770_v23 = vpop.eup %1769 }
 0x569   : > { %v1118_v24 = vmul.f32 %v1770_v23, %v1095_v21  ;;  %v1772_v28 = vpop.eup %1771 }
 0x56a   : > { %v1774_v29 = vpop.eup %1773 }
 0x56b   : > { %1123 = vst.msk [vmem:[#allocation6] sm:$0xff] %vm1122_vm4, %v1118_v24  ;;  %v1776_v34 = vpop.eup %1775 }
 0x5cd   : > { %v1110_v30 = vpop.permute.xlu0 %1109  ;;  %v1116_v31 = vpop.permute.xlu1 %1115 }
 0x5ce   : > { %v1119_v32 = vmul.f32 %v1772_v28, %v1110_v30  ;;  %v1121_v33 = vmul.f32 %v1774_v29, %v1116_v31 }
 0x5d0   : > { %1124 = vst.msk [vmem:[#allocation6 + $0x8] sm:$0xff] %vm1122_vm4, %v1119_v32  ;;  %1126 = vst.msk [vmem:[#allocation6 + $0x18] sm:$0xff] %vm1122_vm4, %v1121_v33 }
 0x5d1   : > { %v1113_v35 = vpop.permute.xlu0 %1112 }
 0x5d2   : > { %v1120_v36 = vmul.f32 %v1776_v34, %v1113_v35 }
 0x5d4   : > { %1125 = vst.msk [vmem:[#allocation6 + $0x10] sm:$0xff] %vm1122_vm4, %v1120_v36 }
 0x5d5 PF: > { %s2515_s10 = sld [smem:[#allocation17_spill]] }
 0x5db   : > { %p1438_p9 = scmp.ne.s32.totalorder %s2515_s10, 1 }
 0x5dd   : > { %1129 = sbr.rel (%p1438_p9) target bundleno = 1665 (0x681), region = 68 }
 0x5e2   : > { %v1132_v37 = vld [vmem:[#allocation4 + $0x10] sm:$0xff]  ;;  %v1130_v38 = vld [vmem:[#allocation4] sm:$0xff]  ;;  %v2006_v39 = vmov 0   ;;  %v1133_v40 = vld [vmem:[#allocation4 + $0x18] sm:$0xff] }
 0x5e3   : > { %1778 = vset.pattern.permute.xlu1 %v2006_v39  ;;  %1777 = vset.pattern.permute.xlu0 %v2006_v39  ;;  %v1131_v41 = vld [vmem:[#allocation4 + $0x8] sm:$0xff]  ;;  %v1134_v43 = vld [vmem:[#allocation6] sm:$0xff]  ;;  %v1137_v44 = vld [vmem:[#allocation6 + $0x18] sm:$0xff] }
 0x5e4   : > { %1180 = vperm.xlu1 %1778, %v1132_v37   ;;  %1140 = vperm.xlu0 %1777, %v1130_v38   ;;  %v1135_v42 = vld [vmem:[#allocation6 + $0x8] sm:$0xff]  ;;  %v1136_v45 = vld [vmem:[#allocation6 + $0x10] sm:$0xff] }
 0x5e8   : > { %1200 = vperm.xlu1 %1778, %v1133_v40   ;;  %1160 = vperm.xlu0 %1777, %v1131_v41  }
 0x5ec   : > { %1171 = vperm.xlu1 %1778, %v1135_v42   ;;  %1151 = vperm.xlu0 %1777, %v1134_v43  }
 0x5f0   : > { %1211 = vperm.xlu1 %1778, %v1137_v44   ;;  %1191 = vperm.xlu0 %1777, %v1136_v45  }
 0x65f   : > { %v1181_v46 = vpop.permute.xlu1 %1180  ;;  %v1141_v47 = vpop.permute.xlu0 %1140 }
 0x660   : > { %v1183_v48 = vsub.f32 %v2303_v51, %v1181_v46  ;;  %v1184_v49 = vsub.f32 %v2307_v55, %v1181_v46  ;;  %v1143_v52 = vsub.f32 %v2301_v50, %v1141_v47  ;;  %v1144_v53 = vsub.f32 %v2305_v54, %v1141_v47 }
 0x662   : > { %v1185_v56 = vmul.f32 1.442695, %v1183_v48  ;;  %v1187_v57 = vmul.f32 1.442695, %v1184_v49  ;;  %v1145_v0 = vmul.f32 1.442695, %v1143_v52 }
 0x663   : > { %v1201_v60 = vpop.permute.xlu1 %1200  ;;  %v1161_v61 = vpop.permute.xlu0 %1160  ;;  %v1147_v3 = vmul.f32 1.442695, %v1144_v53 }
 0x664   : > { %v1203_v1 = vsub.f32 %v2311_v59, %v1201_v60  ;;  %v1163_v2 = vsub.f32 %v2309_v58, %v1161_v61  ;;  %v1204_v4 = vsub.f32 %v2315_v63, %v1201_v60  ;;  %v1164_v51 = vsub.f32 %v2313_v62, %v1161_v61 }
 0x665   : > { %1779 = vpow2.f32 %v1185_v56 }
 0x666   : > { %v1165_v55 = vmul.f32 1.442695, %v1163_v2  ;;  %1781 = vpow2.f32 %v1187_v57  ;;  %v1167_v50 = vmul.f32 1.442695, %v1164_v51  ;;  %v1205_v54 = vmul.f32 1.442695, %v1203_v1 }
 0x667   : > { %1783 = vpow2.f32 %v1145_v0  ;;  %v1207_v5 = vmul.f32 1.442695, %v1204_v4  ;;  %v1152_v6 = vpop.permute.xlu0 %1151  ;;  %v1172_v8 = vpop.permute.xlu1 %1171 }
 0x668   : > { %1785 = vpow2.f32 %v1147_v3 }
 0x669   : > { %1787 = vpow2.f32 %v1165_v55 }
 0x66a   : > { %1789 = vpow2.f32 %v1167_v50 }
 0x66b   : > { %1791 = vpow2.f32 %v1205_v54  ;;  %v1192_v15 = vpop.permute.xlu0 %1191  ;;  %v1212_v20 = vpop.permute.xlu1 %1211 }
 0x66c   : > { %1793 = vpow2.f32 %v1207_v5 }
 0x672   : > { %v1780_v59 = vpop.eup %1779 }
 0x673   : > { %v1782_v58 = vpop.eup %1781  ;;  %v1194_v18 = vmul.f32 %v1780_v59, %v1192_v15 }
 0x674   : > { %v1784_v7 = vpop.eup %1783  ;;  %v1195_v21 = vmul.f32 %v1782_v58, %v1192_v15 }
 0x675   : > { %v1786_v63 = vpop.eup %1785  ;;  %v1154_v11 = vmul.f32 %v1784_v7, %v1152_v6 }
 0x676   : > { %v1788_v9 = vpop.eup %1787  ;;  %v1155_v14 = vmul.f32 %v1786_v63, %v1152_v6 }
 0x677   : > { %v1790_v62 = vpop.eup %1789  ;;  %v1174_v10 = vmul.f32 %v1788_v9, %v1172_v8 }
 0x678   : > { %v1792_v12 = vpop.eup %1791  ;;  %v1175_v13 = vmul.f32 %v1790_v62, %v1172_v8 }
 0x679   : > { %v1794_v16 = vpop.eup %1793  ;;  %v1176_v17 = vadd.f32 %v1174_v10, %v1154_v11  ;;  %v1214_v22 = vmul.f32 %v1792_v12, %v1212_v20 }
 0x67a   : > { %v1177_v19 = vadd.f32 %v1175_v13, %v1155_v14  ;;  %v1215_v24 = vmul.f32 %v1794_v16, %v1212_v20 }
 0x67b   : > { %v1196_v23 = vadd.f32 %v1194_v18, %v1176_v17 }
 0x67c   : > { %v1197_v25 = vadd.f32 %v1195_v21, %v1177_v19 }
 0x67d   : > { %v1216_v26 = vadd.f32 %v1214_v22, %v1196_v23 }
 0x67e   : > { %v1217_v27 = vadd.f32 %v1215_v24, %v1197_v25 }
 0x67f   : > { %1218 = vst [vmem:[%s2247_s12] sm:$0xff] %v1216_v26 }
 0x680   : > { %1219 = vst [vmem:[%s2247_s12 + $0x8] sm:$0xff] %v1217_v27 }
 0x681 PF: > { %s2516_s11 = sld [smem:[#allocation17_spill]]  ;;  %s1441_s16 = sshll.u32 %s1973_s29, 2 }
 0x682   : > { %s2517_s28 = sld [smem:[#allocation21_spill]]  ;;  %s1238_s19 = sshll.u32 %s2247_s12, 4  ;;  %s1239_s19 = int_to_ptr.vmem [resolvable:$true] %s1238_s19 }
 0x683   : > { %s2518_s7 = sld [smem:[#allocation29_spill]]  ;;  %s1221_s30 = scalar_lea.sflag [#allocation9], %s332_s3 }
 0x684   : > { %s1849_s10 = scalar_lea.vmem %s1239_s19, 256  ;;  %s2007_s0 = smov [#allocation12]  }
 0x685   : > { %p1850_p11 = scmp.ne.s32.totalorder %s1239_s19, %s1849_s10  ;;  %s1853_s4 = sshll.u32 %s2007_s0, 4  ;;  %s1854_s4 = int_to_ptr.vmem [resolvable:$false] %s1853_s4 }
 0x686   : > { %p1856_p7 = scmp.lt.s32.totalorder %s1239_s19, %s1854_s4 }
 0x687   : > { %s1228_s13 = smul.u32 %s1965_s27, %s2516_s11  ;;  %s1855_s27 = scalar_lea.vmem %s1854_s4, 512 }
 0x688   : > { %p2520_p13 = scmp.ne.s32.totalorder %s2517_s28, 0  ;;  %p1857_p3 = scmp.lt.s32.totalorder %s1855_s27, %s1849_s10 }
 0x689   : > { %s1440_s1 = sshll.u32 %s1228_s13, 1  ;;  %s2519_s17 = smov %s2518_s7 }
 0x68a   : > { %s1234_s2 = sadd.s32 %s1441_s16, %s1440_s1  ;;  %p1851_p4 = pnand %p1850_p11, %p2520_p13 }
 0x68b   : > { %s1442_s14 = sshll.u32 %s1234_s2, 7  ;;  %p1858_p10 = por %p1857_p3, %p1856_p7 }
 0x68c   : > { %s1236_s5 = scalar_lea.hbm %s2518_s7, %s1442_s14  ;;  %p1852_p6 = pneg %p1851_p4 }
 0x68e   : > { %p1859_p12 = pnand %p1858_p10, %p1852_p6 }
 0x690   : > { %1862 = shalt.err (!%p1859_p12)
}
 0x691   : > { %s1863_s29 = scalar_lea.hbm %s1236_s5, 256  ;;  %s1867_s11 = scalar_lea.hbm %s2519_s17, 1024 }
 0x692   : > { %p1864_p0 = scmp.ne.s32.totalorder %s1236_s5, %s1863_s29  ;;  %p1868_p5 = scmp.lt.s32.totalorder %s1236_s5, %s2519_s17 }
 0x693   : > { %p1869_p8 = scmp.lt.s32.totalorder %s1867_s11, %s1863_s29 }
 0x694   : > { %p1865_p1 = pnand %p1864_p0, %p2520_p13 }
 0x695   : > { %p1870_p9 = por %p1869_p8, %p1868_p5 }
 0x696   : > { %p1866_p2 = pneg %p1865_p1 }
 0x698   : > { %p1871_p11 = pnand %p1870_p9, %p1866_p2 }
 0x69a   : > { %1874 = shalt.err (!%p1871_p11)
}
 0x69b   : > { %1512 = dma.vmem_to_hbm [thread:$0]  (%p2520_p13), %s1239_s19, 256, %s1236_s5, %s1221_s30  }
 0x69c PF: > { %s2521_s4 = sld [smem:[#allocation20_spill]] }
 0x69d   : > { %s2522_s0 = sld [smem:[#allocation16_spill]] }
 0x69e   : > { %s2523_s1 = sld [smem:[#allocation22_spill]] }
 0x6a2   : > { %p1529_p4 = scmp.ge.s32.totalorder %s2521_s4, 2 }
 0x6a3   : > { %s1250_s2 = sand.u32 1, %s2522_s0  }
 0x6a4   : > { %p2524_p6 = scmp.ne.s32.totalorder %s2523_s1, 0  ;;  %s1251_s14 = scalar_lea.sflag [#allocation9], %s1250_s2 }
 0x6a6   : > { %p1523_p7 = pnand %p1529_p4, %p2524_p6 }
 0x6a8   : > { %p1524_p3 = pneg %p1523_p7 }
 0x6aa   : > { %1936 = dma.done.wait (%p1524_p3), %s1251_s14, 256  }
 0x6ab   : > { %1938 = vsyncadd (%p1524_p3), %s1251_s14, 4294967040  ;;  %s23_s6 = sadd.s32 1, %s2521_s4   ;;  %s2526_s27 = sld [smem:[#allocation18_spill]] }
 0x6ac   : > { %p2412_p10 = scmp.ge.s32.totalorder %s23_s6, 10   ;;  %s2527_s28 = sld [smem:[#allocation19_spill]] }
 0x6ad   : > { %s2528_s19 = smov %s2546_s21  ;;  %s2530_s21 = smov %s1945_s22 }
 0x6ae   : > { %s2531_s22 = smov %s1949_s23  ;;  %s2532_s23 = smov %s2211_s20 }
 0x6af   : > { %s2533_s24 = smov %s1957_s25  ;;  %s2534_s25 = smov %s1961_s26 }
 0x6b0   : > { %s2535_s26 = smov %s2188_s15  ;;  %s2536_s29 = smov %s1985_s8 }
 0x6b1   : > { %s2537_s30 = smov %s2542_s18  ;;  %s2538_s7 = smov %s2528_s19 }
 0x6b2   : > { %s2539_s8 = smov %s2550_s9  ;;  %s2540_s9 = smov %s23_s6 }
 0x6b3   :  { %22 = sbr.rel (!%p2412_p10) target bundleno = 19 (0x13), region = 116 }
 0x6b8   :  { %1256 = vsyncpa [#allocation8], 1 }
 0x6b9   :  { %1258 = vsyncpa [#allocation8 + $0x1], 1 }
 0x6ba   :  { %1259 = vsyncpa [#allocation11], 1 }
 0x6bb   :  { %1261 = vsyncpa [#allocation11 + $0x1], 1 }
 0x6bc   :  { %1262 = vsyncpa [#allocation9], 1 }
 0x6bd   :  { %1264 = vsyncpa [#allocation9 + $0x1], 1 }

</bundles_post_ra>
